<compile_context>
chip_gen: v7x
topology: tpu7x:2x2x1
jax: 0.10.0
libtpu: 0.0.40
codegen_flags: <defaults>
</compile_context>

<pallas_src>
import jax
import jax.numpy as jnp
from jax.experimental import pallas as pl
from jax.experimental.pallas import tpu as pltpu


def _round_up(v, m):
    return -(-v // m) * m


def level_attention_forward(x_nchw, w1, b1, w2, b2, tile_rows=32):
    """Forward pass of LevelAttentionModel.

    x_nchw : (N, Cin, H, W) float32
    w1     : (F, Cin, 3, 3), b1: (F,)   conv1 params (PyTorch OIHW)
    w2     : (1, F, 3, 3),  b2: (1,)    conv5 params
    returns: (N, 1, H, W) sigmoid attention map
    """
    N, Cin, H, W = x_nchw.shape
    F = w1.shape[0]

    # Row tile: multiple of 8, no larger than the (rounded-up) image height.
    TH = max(8, _round_up(min(int(tile_rows), _round_up(H, 8)), 8))
    assert TH % 8 == 0 and TH % 4 == 0          # halo index_map assumes TH % 4 == 0
    n_tiles = -(-H // TH)
    H_pad = n_tiles * TH

    # Padded row stride: 128-lane aligned when the extra padding is small,
    # else 32-aligned (L2 = TH*W4 and LH = 4*W4 stay multiples of 128 either way).
    w4_128 = _round_up(W + 4, 128)
    w4_32 = _round_up(W + 4, 32)
    W4 = w4_128 if (w4_128 - (W + 4)) <= 0.15 * (W + 4) else w4_32
    assert W4 >= W + 4                          # keeps row-wrap columns sliced off

    L2 = TH * W4                                # per-tile output slab (lane-dense)
    LH = 4 * W4                                 # halo: 4 extra padded rows
    L1 = L2 + 2 * W4 + 2                        # extended conv1 output length
    TAIL = 4                                    # zero tail so every tap slice fits
    Lx = L2 + LH + TAIL                         # assembled input window length
    OFFS = tuple(r * W4 + c for r in range(3) for c in range(3))
    assert max(OFFS) + L1 <= Lx

    # ---- host-side layout prep (plain XLA, tiny) -----------------------------
    # Zero-pad: 2 rows top, 2+(H_pad-H) bottom, 2 cols left, rest right.
    xp = jnp.pad(x_nchw, ((0, 0), (0, 0), (2, 2 + H_pad - H), (2, W4 - W - 2)))
    xs = xp.reshape(N, Cin, (H_pad + 4) * W4).astype(jnp.bfloat16)

    # conv1 weights stacked along K to match the in-kernel patch stack:
    # column t*Cin + cin  <->  tap t = r*3 + c, input channel cin.
    w1s = jnp.transpose(w1, (0, 2, 3, 1)).reshape(F, 9 * Cin).astype(jnp.bfloat16)
    b1c = b1.reshape(F, 1).astype(jnp.float32)
    # conv5 weights: one (1, F) LHS per tap.
    w2r = jnp.transpose(w2, (2, 3, 0, 1)).reshape(9, 1, F).astype(jnp.bfloat16)
    b2c = b2.reshape(1, 1).astype(jnp.float32)

    # Tile-independent index table (fetched once; constant index_map):
    #   row 0: extended-output row k = p // W4,  row 1: column-validity flag.
    pvec = jnp.arange(L1, dtype=jnp.int32)
    krow = pvec // W4
    ccol = pvec - krow * W4
    col_ok = ((ccol >= 1) & (ccol <= W)).astype(jnp.int32)
    kc = jnp.stack([krow, col_ok], axis=0)                      # (2, L1) int32

    # ---- fused Pallas kernel -------------------------------------------------
    def kernel(xm_ref, xh_ref, kc_ref, w1_ref, b1_ref, w2_ref, b2_ref, o_ref):
        i = pl.program_id(1)

        # Assemble the (Cin, Lx) input window as a value: TH main rows + 4 halo
        # rows (contiguous in HBM, two views of the same array) + zero tail.
        xt = jnp.concatenate(
            [xm_ref[...], xh_ref[...], jnp.zeros((Cin, TAIL), jnp.bfloat16)],
            axis=1)

        # conv1: stack the 9 shifted windows along K -> ONE MXU matmul with
        # K = 9*Cin (instead of 9 matmuls with K = Cin and 9 f32 VALU drains).
        patches = jnp.concatenate([xt[:, off:off + L1] for off in OFFS], axis=0)
        acc = jnp.dot(w1_ref[...], patches,
                      preferred_element_type=jnp.float32)        # (F, L1) f32

        # Validity mask computed in-kernel (no per-step HBM mask traffic).
        # Image row of feat position p is i*TH - 1 + krow(p); valid rows are
        # [0, H)  <=>  krow in [1 - i*TH, H + 1 - i*TH).
        krow_v = kc_ref[0:1, :]                                   # (1, L1) i32
        colok_v = kc_ref[1:2, :]
        lo = 1 - i * TH
        hi = H + 1 - i * TH
        valid = (krow_v >= lo) & (krow_v < hi) & (colok_v > 0)

        # bias + ReLU, zero outside the real image (this also realizes conv5's
        # zero padding of the conv1 output), then bf16 for the MXU.
        feat = jnp.where(valid, jnp.maximum(acc + b1_ref[...], 0.0), 0.0)
        feat = feat.astype(jnp.bfloat16)                          # (F, L1)

        # conv5 (1 output channel): F-contraction on the MXU, one accumulating
        # (1, F) x (F, L2) matmul per tap -- no cross-sublane VPU reductions.
        z = jnp.zeros((1, L2), jnp.float32)
        for t in range(9):
            off = OFFS[t]
            z = z + jnp.dot(w2_ref[t], feat[:, off:off + L2],
                            preferred_element_type=jnp.float32)
        z = z + b2_ref[...]

        # sigmoid on the EUP: exp + approximate reciprocal.
        o_ref[...] = pl.reciprocal(1.0 + jnp.exp(-z), approx=True)

    # VMEM working-set estimate (double-buffered inputs + constants + in-kernel
    # values), x2 margin, capped at 40 MiB (v7x has 64 MiB physical VMEM).
    vmem_need = (
        2 * Cin * (L2 + LH) * 2                                   # input views
        + 2 * (F * 9 * Cin * 2 + F * 4 + 9 * F * 2 + 2 * L1 * 4 + 8)  # consts
        + 2 * L2 * 4                                              # output block
        + Cin * Lx * 2 + 9 * Cin * L1 * 2                         # xt + patches
        + F * L1 * (4 + 4 + 2)                                    # acc/feat/feat16
        + 8 * L2 * 4                                              # conv5 acc etc.
    )
    vmem_limit = int(min(max(2 * vmem_need, 16 * 2 ** 20), 40 * 2 ** 20))

    out = pl.pallas_call(
        kernel,
        out_shape=jax.ShapeDtypeStruct((N * n_tiles, 1, L2), jnp.float32),
        grid_spec=pltpu.PrefetchScalarGridSpec(
            num_scalar_prefetch=0,
            grid=(N, n_tiles),
            in_specs=[
                # main row tile (TH rows) of this image
                pl.BlockSpec((None, Cin, L2), lambda n, i: (n, 0, i)),
                # 4-row halo directly below the main tile (contiguous in HBM)
                pl.BlockSpec((None, Cin, LH),
                             lambda n, i: (n, 0, (i + 1) * (TH // 4))),
                # constant index table + weights / biases (fetched once)
                pl.BlockSpec((2, L1), lambda n, i: (0, 0)),
                pl.BlockSpec((F, 9 * Cin), lambda n, i: (0, 0)),
                pl.BlockSpec((F, 1), lambda n, i: (0, 0)),
                pl.BlockSpec((9, 1, F), lambda n, i: (0, 0, 0)),
                pl.BlockSpec((1, 1), lambda n, i: (0, 0)),
            ],
            out_specs=pl.BlockSpec((None, 1, L2),
                                   lambda n, i: (n * n_tiles + i, 0, 0)),
        ),
        compiler_params=pltpu.CompilerParams(
            dimension_semantics=("parallel", "parallel"),
            vmem_limit_bytes=vmem_limit,
        ),
    )(xs, xs, kc, w1s, b1c, w2r, b2c)

    # Un-flatten, drop the padded rows/cols, add the channel dim.
    att = out.reshape(N, H_pad, W4)[:, :H, :W]
    return att[:, None, :, :]


# ------------------------ pure-JAX reference (for check) ---------------------

def _reference(x_nchw, w1, b1, w2, b2):
    dn = ("NCHW", "OIHW", "NCHW")
    o = jax.lax.conv_general_dilated(x_nchw, w1, (1, 1), ((1, 1), (1, 1)),
                                     dimension_numbers=dn)
    o = jnp.maximum(o + b1.reshape(1, -1, 1, 1), 0.0)
    o = jax.lax.conv_general_dilated(o, w2, (1, 1), ((1, 1), (1, 1)),
                                     dimension_numbers=dn)
    o = o + b2.reshape(1, -1, 1, 1)
    return jax.nn.sigmoid(o)


# --------------------------------- main ---------------------------------------

if __name__ == "__main__":
    key = jax.random.PRNGKey(0)
    k_x, k_w1, k_b1, k_w2, k_b2 = jax.random.split(key, 5)

    # Small shapes consistent with the module: batch=2, num_features_in=4,
    # feature_size=32 (scaled-down 256), spatial 16x16, stride=1.
    N, Cin, H, W = 2, 4, 16, 16
    Fs = 32

    x = jax.random.normal(k_x, (N, Cin, H, W), dtype=jnp.float32)
    w1 = 0.1 * jax.random.normal(k_w1, (Fs, Cin, 3, 3), dtype=jnp.float32)
    b1 = 0.1 * jax.random.normal(k_b1, (Fs,), dtype=jnp.float32)
    w2 = 0.1 * jax.random.normal(k_w2, (1, Fs, 3, 3), dtype=jnp.float32)
    b2 = 0.1 * jax.random.normal(k_b2, (1,), dtype=jnp.float32)

    out = level_attention_forward(x, w1, b1, w2, b2, tile_rows=32)
    out = jax.block_until_ready(out)

    ref = jax.block_until_ready(_reference(x, w1, b1, w2, b2))
    assert out.shape == (N, 1, H, W)
    # Tolerance accounts for bf16 MXU operands (x, w1, conv1 features, w2; all
    # accumulation in f32) and the approximate EUP reciprocal in the sigmoid.
    assert jnp.allclose(out, ref, rtol=2e-2, atol=2e-2), "mismatch vs reference"

    print("KERNEL_OK")
</pallas_src>

<mosaic_0001>
module attributes {stable_mosaic.version = 11 : i64} {
  func.func @kernel(%arg0: i32, %arg1: i32, %arg2: memref<1x4x512xbf16, #tpu.memory_space<vmem>>, %arg3: memref<1x4x128xbf16, #tpu.memory_space<vmem>>, %arg4: memref<2x578xi32, #tpu.memory_space<vmem>>, %arg5: memref<32x36xbf16, #tpu.memory_space<vmem>>, %arg6: memref<32x1xf32, #tpu.memory_space<vmem>>, %arg7: memref<9x1x32xbf16, #tpu.memory_space<vmem>>, %arg8: memref<1x1xf32, #tpu.memory_space<vmem>>, %arg9: memref<1x1x512xf32, #tpu.memory_space<vmem>>) attributes {dimension_semantics = [#tpu.dimension_semantics<parallel>, #tpu.dimension_semantics<parallel>], iteration_bounds = array<i64: 2, 1>, scalar_prefetch = 0 : i64, scratch_operands = 0 : i64, tpu.core_type = #tpu.core_type<tc>, window_params = [{transform_indices = @transform_0, window_bounds = array<i64: 1, 4, 512>}, {transform_indices = @transform_1, window_bounds = array<i64: 1, 4, 128>}, {pipeline_mode = #tpu.pipeline_mode<synchronous>, transform_indices = @transform_2, window_bounds = array<i64: 2, 578>}, {pipeline_mode = #tpu.pipeline_mode<synchronous>, transform_indices = @transform_3, window_bounds = array<i64: 32, 36>}, {pipeline_mode = #tpu.pipeline_mode<synchronous>, transform_indices = @transform_4, window_bounds = array<i64: 32, 1>}, {pipeline_mode = #tpu.pipeline_mode<synchronous>, transform_indices = @transform_5, window_bounds = array<i64: 9, 1, 32>}, {pipeline_mode = #tpu.pipeline_mode<synchronous>, transform_indices = @transform_6, window_bounds = array<i64: 1, 1>}, {transform_indices = @transform_7, window_bounds = array<i64: 1, 1, 512>}]} {
    %c0 = arith.constant 0 : index
    %c0_0 = arith.constant 0 : index
    %c0_1 = arith.constant 0 : index
    %0 = vector.load %arg2[%c0, %c0_0, %c0_1] : memref<1x4x512xbf16, #tpu.memory_space<vmem>>, vector<1x4x512xbf16>
    %1 = vector.shape_cast %0 : vector<1x4x512xbf16> to vector<4x512xbf16>
    %c0_2 = arith.constant 0 : index
    %c0_3 = arith.constant 0 : index
    %c0_4 = arith.constant 0 : index
    %2 = vector.load %arg3[%c0_2, %c0_3, %c0_4] : memref<1x4x128xbf16, #tpu.memory_space<vmem>>, vector<1x4x128xbf16>
    %3 = vector.shape_cast %2 : vector<1x4x128xbf16> to vector<4x128xbf16>
    %cst = arith.constant 0.000000e+00 : bf16
    %4 = vector.broadcast %cst : bf16 to vector<4x4xbf16>
    %5 = tpu.concatenate %1, %3, %4 in 1 : vector<4x512xbf16>, vector<4x128xbf16>, vector<4x4xbf16> -> vector<4x644xbf16>
    %6 = vector.extract_strided_slice %5 {offsets = [0, 0], sizes = [4, 578], strides = [1, 1]} : vector<4x644xbf16> to vector<4x578xbf16>
    %7 = vector.extract_strided_slice %5 {offsets = [0, 1], sizes = [4, 578], strides = [1, 1]} : vector<4x644xbf16> to vector<4x578xbf16>
    %8 = vector.extract_strided_slice %5 {offsets = [0, 2], sizes = [4, 578], strides = [1, 1]} : vector<4x644xbf16> to vector<4x578xbf16>
    %9 = vector.extract_strided_slice %5 {offsets = [0, 32], sizes = [4, 578], strides = [1, 1]} : vector<4x644xbf16> to vector<4x578xbf16>
    %10 = vector.extract_strided_slice %5 {offsets = [0, 33], sizes = [4, 578], strides = [1, 1]} : vector<4x644xbf16> to vector<4x578xbf16>
    %11 = vector.extract_strided_slice %5 {offsets = [0, 34], sizes = [4, 578], strides = [1, 1]} : vector<4x644xbf16> to vector<4x578xbf16>
    %12 = vector.extract_strided_slice %5 {offsets = [0, 64], sizes = [4, 578], strides = [1, 1]} : vector<4x644xbf16> to vector<4x578xbf16>
    %13 = vector.extract_strided_slice %5 {offsets = [0, 65], sizes = [4, 578], strides = [1, 1]} : vector<4x644xbf16> to vector<4x578xbf16>
    %14 = vector.extract_strided_slice %5 {offsets = [0, 66], sizes = [4, 578], strides = [1, 1]} : vector<4x644xbf16> to vector<4x578xbf16>
    %15 = tpu.concatenate %6, %7, %8, %9, %10, %11, %12, %13, %14 in 0 : vector<4x578xbf16>, vector<4x578xbf16>, vector<4x578xbf16>, vector<4x578xbf16>, vector<4x578xbf16>, vector<4x578xbf16>, vector<4x578xbf16>, vector<4x578xbf16>, vector<4x578xbf16> -> vector<36x578xbf16>
    %c0_5 = arith.constant 0 : index
    %c0_6 = arith.constant 0 : index
    %16 = vector.load %arg5[%c0_5, %c0_6] : memref<32x36xbf16, #tpu.memory_space<vmem>>, vector<32x36xbf16>
    %cst_7 = arith.constant dense<0.000000e+00> : vector<32x578xf32>
    %17 = tpu.matmul %16, %15, %cst_7 {dimension_numbers = #tpu.dot_dimension_numbers<[1], [0], [0], [1], [0, 0, 1, 1], [], []>} : vector<32x36xbf16>, vector<36x578xbf16>, vector<32x578xf32> -> vector<32x578xf32>
    %c0_8 = arith.constant 0 : index
    %c0_9 = arith.constant 0 : index
    %18 = vector.load %arg4[%c0_8, %c0_9] : memref<2x578xi32, #tpu.memory_space<vmem>>, vector<1x578xi32>
    %c1 = arith.constant 1 : index
    %c0_10 = arith.constant 0 : index
    %19 = vector.load %arg4[%c1, %c0_10] : memref<2x578xi32, #tpu.memory_space<vmem>>, vector<1x578xi32>
    %c16_i32 = arith.constant 16 : i32
    %20 = arith.muli %arg1, %c16_i32 : i32
    %c1_i32 = arith.constant 1 : i32
    %21 = arith.subi %c1_i32, %20 : i32
    %c16_i32_11 = arith.constant 16 : i32
    %22 = arith.muli %arg1, %c16_i32_11 : i32
    %c17_i32 = arith.constant 17 : i32
    %23 = arith.subi %c17_i32, %22 : i32
    %24 = vector.broadcast %21 : i32 to vector<1x578xi32>
    %25 = arith.cmpi sge, %18, %24 : vector<1x578xi32>
    %26 = vector.broadcast %23 : i32 to vector<1x578xi32>
    %27 = arith.cmpi slt, %18, %26 : vector<1x578xi32>
    %28 = arith.andi %25, %27 : vector<1x578xi1>
    %c0_i32 = arith.constant 0 : i32
    %29 = vector.broadcast %c0_i32 : i32 to vector<1x578xi32>
    %30 = arith.cmpi sgt, %19, %29 : vector<1x578xi32>
    %31 = arith.andi %28, %30 : vector<1x578xi1>
    %c0_12 = arith.constant 0 : index
    %c0_13 = arith.constant 0 : index
    %32 = vector.load %arg6[%c0_12, %c0_13] : memref<32x1xf32, #tpu.memory_space<vmem>>, vector<32x1xf32>
    %33 = vector.broadcast %32 : vector<32x1xf32> to vector<32x578xf32>
    %34 = arith.addf %17, %33 : vector<32x578xf32>
    %cst_14 = arith.constant 0.000000e+00 : f32
    %35 = vector.broadcast %cst_14 : f32 to vector<32x578xf32>
    %36 = arith.maximumf %34, %35 : vector<32x578xf32>
    %cst_15 = arith.constant 0.000000e+00 : f32
    %37 = vector.shape_cast %31 : vector<1x578xi1> to vector<1x578xi1>
    %38 = vector.broadcast %37 : vector<1x578xi1> to vector<32x578xi1>
    %39 = vector.broadcast %cst_15 : f32 to vector<32x578xf32>
    %40 = arith.select %38, %36, %39 : vector<32x578xi1>, vector<32x578xf32>
    %41 = arith.truncf %40 : vector<32x578xf32> to vector<32x578xbf16>
    %cst_16 = arith.constant 0.000000e+00 : f32
    %42 = vector.broadcast %cst_16 : f32 to vector<1x512xf32>
    %c0_17 = arith.constant 0 : index
    %c0_18 = arith.constant 0 : index
    %c0_19 = arith.constant 0 : index
    %43 = vector.load %arg7[%c0_17, %c0_18, %c0_19] : memref<9x1x32xbf16, #tpu.memory_space<vmem>>, vector<1x1x32xbf16>
    %44 = vector.shape_cast %43 : vector<1x1x32xbf16> to vector<1x32xbf16>
    %45 = vector.extract_strided_slice %41 {offsets = [0, 0], sizes = [32, 512], strides = [1, 1]} : vector<32x578xbf16> to vector<32x512xbf16>
    %cst_20 = arith.constant dense<0.000000e+00> : vector<1x512xf32>
    %46 = tpu.matmul %44, %45, %cst_20 {dimension_numbers = #tpu.dot_dimension_numbers<[1], [0], [0], [1], [0, 0, 1, 1], [], []>} : vector<1x32xbf16>, vector<32x512xbf16>, vector<1x512xf32> -> vector<1x512xf32>
    %47 = arith.addf %42, %46 : vector<1x512xf32>
    %c1_21 = arith.constant 1 : index
    %c0_22 = arith.constant 0 : index
    %c0_23 = arith.constant 0 : index
    %48 = vector.load %arg7[%c1_21, %c0_22, %c0_23] : memref<9x1x32xbf16, #tpu.memory_space<vmem>>, vector<1x1x32xbf16>
    %49 = vector.shape_cast %48 : vector<1x1x32xbf16> to vector<1x32xbf16>
    %50 = vector.extract_strided_slice %41 {offsets = [0, 1], sizes = [32, 512], strides = [1, 1]} : vector<32x578xbf16> to vector<32x512xbf16>
    %cst_24 = arith.constant dense<0.000000e+00> : vector<1x512xf32>
    %51 = tpu.matmul %49, %50, %cst_24 {dimension_numbers = #tpu.dot_dimension_numbers<[1], [0], [0], [1], [0, 0, 1, 1], [], []>} : vector<1x32xbf16>, vector<32x512xbf16>, vector<1x512xf32> -> vector<1x512xf32>
    %52 = arith.addf %47, %51 : vector<1x512xf32>
    %c2 = arith.constant 2 : index
    %c0_25 = arith.constant 0 : index
    %c0_26 = arith.constant 0 : index
    %53 = vector.load %arg7[%c2, %c0_25, %c0_26] : memref<9x1x32xbf16, #tpu.memory_space<vmem>>, vector<1x1x32xbf16>
    %54 = vector.shape_cast %53 : vector<1x1x32xbf16> to vector<1x32xbf16>
    %55 = vector.extract_strided_slice %41 {offsets = [0, 2], sizes = [32, 512], strides = [1, 1]} : vector<32x578xbf16> to vector<32x512xbf16>
    %cst_27 = arith.constant dense<0.000000e+00> : vector<1x512xf32>
    %56 = tpu.matmul %54, %55, %cst_27 {dimension_numbers = #tpu.dot_dimension_numbers<[1], [0], [0], [1], [0, 0, 1, 1], [], []>} : vector<1x32xbf16>, vector<32x512xbf16>, vector<1x512xf32> -> vector<1x512xf32>
    %57 = arith.addf %52, %56 : vector<1x512xf32>
    %c3 = arith.constant 3 : index
    %c0_28 = arith.constant 0 : index
    %c0_29 = arith.constant 0 : index
    %58 = vector.load %arg7[%c3, %c0_28, %c0_29] : memref<9x1x32xbf16, #tpu.memory_space<vmem>>, vector<1x1x32xbf16>
    %59 = vector.shape_cast %58 : vector<1x1x32xbf16> to vector<1x32xbf16>
    %60 = vector.extract_strided_slice %41 {offsets = [0, 32], sizes = [32, 512], strides = [1, 1]} : vector<32x578xbf16> to vector<32x512xbf16>
    %cst_30 = arith.constant dense<0.000000e+00> : vector<1x512xf32>
    %61 = tpu.matmul %59, %60, %cst_30 {dimension_numbers = #tpu.dot_dimension_numbers<[1], [0], [0], [1], [0, 0, 1, 1], [], []>} : vector<1x32xbf16>, vector<32x512xbf16>, vector<1x512xf32> -> vector<1x512xf32>
    %62 = arith.addf %57, %61 : vector<1x512xf32>
    %c4 = arith.constant 4 : index
    %c0_31 = arith.constant 0 : index
    %c0_32 = arith.constant 0 : index
    %63 = vector.load %arg7[%c4, %c0_31, %c0_32] : memref<9x1x32xbf16, #tpu.memory_space<vmem>>, vector<1x1x32xbf16>
    %64 = vector.shape_cast %63 : vector<1x1x32xbf16> to vector<1x32xbf16>
    %65 = vector.extract_strided_slice %41 {offsets = [0, 33], sizes = [32, 512], strides = [1, 1]} : vector<32x578xbf16> to vector<32x512xbf16>
    %cst_33 = arith.constant dense<0.000000e+00> : vector<1x512xf32>
    %66 = tpu.matmul %64, %65, %cst_33 {dimension_numbers = #tpu.dot_dimension_numbers<[1], [0], [0], [1], [0, 0, 1, 1], [], []>} : vector<1x32xbf16>, vector<32x512xbf16>, vector<1x512xf32> -> vector<1x512xf32>
    %67 = arith.addf %62, %66 : vector<1x512xf32>
    %c5 = arith.constant 5 : index
    %c0_34 = arith.constant 0 : index
    %c0_35 = arith.constant 0 : index
    %68 = vector.load %arg7[%c5, %c0_34, %c0_35] : memref<9x1x32xbf16, #tpu.memory_space<vmem>>, vector<1x1x32xbf16>
    %69 = vector.shape_cast %68 : vector<1x1x32xbf16> to vector<1x32xbf16>
    %70 = vector.extract_strided_slice %41 {offsets = [0, 34], sizes = [32, 512], strides = [1, 1]} : vector<32x578xbf16> to vector<32x512xbf16>
    %cst_36 = arith.constant dense<0.000000e+00> : vector<1x512xf32>
    %71 = tpu.matmul %69, %70, %cst_36 {dimension_numbers = #tpu.dot_dimension_numbers<[1], [0], [0], [1], [0, 0, 1, 1], [], []>} : vector<1x32xbf16>, vector<32x512xbf16>, vector<1x512xf32> -> vector<1x512xf32>
    %72 = arith.addf %67, %71 : vector<1x512xf32>
    %c6 = arith.constant 6 : index
    %c0_37 = arith.constant 0 : index
    %c0_38 = arith.constant 0 : index
    %73 = vector.load %arg7[%c6, %c0_37, %c0_38] : memref<9x1x32xbf16, #tpu.memory_space<vmem>>, vector<1x1x32xbf16>
    %74 = vector.shape_cast %73 : vector<1x1x32xbf16> to vector<1x32xbf16>
    %75 = vector.extract_strided_slice %41 {offsets = [0, 64], sizes = [32, 512], strides = [1, 1]} : vector<32x578xbf16> to vector<32x512xbf16>
    %cst_39 = arith.constant dense<0.000000e+00> : vector<1x512xf32>
    %76 = tpu.matmul %74, %75, %cst_39 {dimension_numbers = #tpu.dot_dimension_numbers<[1], [0], [0], [1], [0, 0, 1, 1], [], []>} : vector<1x32xbf16>, vector<32x512xbf16>, vector<1x512xf32> -> vector<1x512xf32>
    %77 = arith.addf %72, %76 : vector<1x512xf32>
    %c7 = arith.constant 7 : index
    %c0_40 = arith.constant 0 : index
    %c0_41 = arith.constant 0 : index
    %78 = vector.load %arg7[%c7, %c0_40, %c0_41] : memref<9x1x32xbf16, #tpu.memory_space<vmem>>, vector<1x1x32xbf16>
    %79 = vector.shape_cast %78 : vector<1x1x32xbf16> to vector<1x32xbf16>
    %80 = vector.extract_strided_slice %41 {offsets = [0, 65], sizes = [32, 512], strides = [1, 1]} : vector<32x578xbf16> to vector<32x512xbf16>
    %cst_42 = arith.constant dense<0.000000e+00> : vector<1x512xf32>
    %81 = tpu.matmul %79, %80, %cst_42 {dimension_numbers = #tpu.dot_dimension_numbers<[1], [0], [0], [1], [0, 0, 1, 1], [], []>} : vector<1x32xbf16>, vector<32x512xbf16>, vector<1x512xf32> -> vector<1x512xf32>
    %82 = arith.addf %77, %81 : vector<1x512xf32>
    %c8 = arith.constant 8 : index
    %c0_43 = arith.constant 0 : index
    %c0_44 = arith.constant 0 : index
    %83 = vector.load %arg7[%c8, %c0_43, %c0_44] : memref<9x1x32xbf16, #tpu.memory_space<vmem>>, vector<1x1x32xbf16>
    %84 = vector.shape_cast %83 : vector<1x1x32xbf16> to vector<1x32xbf16>
    %85 = vector.extract_strided_slice %41 {offsets = [0, 66], sizes = [32, 512], strides = [1, 1]} : vector<32x578xbf16> to vector<32x512xbf16>
    %cst_45 = arith.constant dense<0.000000e+00> : vector<1x512xf32>
    %86 = tpu.matmul %84, %85, %cst_45 {dimension_numbers = #tpu.dot_dimension_numbers<[1], [0], [0], [1], [0, 0, 1, 1], [], []>} : vector<1x32xbf16>, vector<32x512xbf16>, vector<1x512xf32> -> vector<1x512xf32>
    %87 = arith.addf %82, %86 : vector<1x512xf32>
    %c0_46 = arith.constant 0 : index
    %c0_47 = arith.constant 0 : index
    %88 = vector.load %arg8[%c0_46, %c0_47] : memref<1x1xf32, #tpu.memory_space<vmem>>, vector<1x1xf32>
    %89 = vector.broadcast %88 : vector<1x1xf32> to vector<1x512xf32>
    %90 = arith.addf %87, %89 : vector<1x512xf32>
    %cst_48 = arith.constant 0.000000e+00 : f32
    %91 = vector.broadcast %cst_48 : f32 to vector<1x512xf32>
    %92 = arith.subf %91, %90 : vector<1x512xf32>
    %93 = math.exp %92 : vector<1x512xf32>
    %cst_49 = arith.constant 1.000000e+00 : f32
    %94 = vector.broadcast %cst_49 : f32 to vector<1x512xf32>
    %95 = arith.addf %94, %93 : vector<1x512xf32>
    %96 = tpu.reciprocal %95 {approx = true} : vector<1x512xf32> -> vector<1x512xf32>
    %c0_50 = arith.constant 0 : index
    %c0_51 = arith.constant 0 : index
    %c0_52 = arith.constant 0 : index
    %97 = vector.load %arg9[%c0_50, %c0_51, %c0_52] : memref<1x1x512xf32, #tpu.memory_space<vmem>>, vector<1x1x512xf32>
    %98 = vector.shape_cast %97 : vector<1x1x512xf32> to vector<1x512xf32>
    %99 = vector.shape_cast %96 : vector<1x512xf32> to vector<1x1x512xf32>
    tpu.vector_store %arg9[%c0_50, %c0_51, %c0_52], %99 {strides = array<i32>} : memref<1x1x512xf32, #tpu.memory_space<vmem>>, vector<1x1x512xf32>,
    return
  }
  func.func @transform_0(%arg0: i32, %arg1: i32) -> (i32, i32, i32) {
    %c0_i32 = arith.constant 0 : i32
    %c0_i32_0 = arith.constant 0 : i32
    return %arg0, %c0_i32, %arg1 : i32, i32, i32
  }
  func.func @transform_1(%arg0: i32, %arg1: i32) -> (i32, i32, i32) {
    %c1_i32 = arith.constant 1 : i32
    %0 = arith.addi %arg1, %c1_i32 : i32
    %c4_i32 = arith.constant 4 : i32
    %1 = arith.muli %0, %c4_i32 : i32
    %c0_i32 = arith.constant 0 : i32
    %c0_i32_0 = arith.constant 0 : i32
    return %arg0, %c0_i32, %1 : i32, i32, i32
  }
  func.func @transform_2(%arg0: i32, %arg1: i32) -> (i32, i32) {
    %c0_i32 = arith.constant 0 : i32
    %c0_i32_0 = arith.constant 0 : i32
    %c0_i32_1 = arith.constant 0 : i32
    return %c0_i32, %c0_i32_0 : i32, i32
  }
  func.func @transform_3(%arg0: i32, %arg1: i32) -> (i32, i32) {
    %c0_i32 = arith.constant 0 : i32
    %c0_i32_0 = arith.constant 0 : i32
    %c0_i32_1 = arith.constant 0 : i32
    return %c0_i32, %c0_i32_0 : i32, i32
  }
  func.func @transform_4(%arg0: i32, %arg1: i32) -> (i32, i32) {
    %c0_i32 = arith.constant 0 : i32
    %c0_i32_0 = arith.constant 0 : i32
    %c0_i32_1 = arith.constant 0 : i32
    return %c0_i32, %c0_i32_0 : i32, i32
  }
  func.func @transform_5(%arg0: i32, %arg1: i32) -> (i32, i32, i32) {
    %c0_i32 = arith.constant 0 : i32
    %c0_i32_0 = arith.constant 0 : i32
    %c0_i32_1 = arith.constant 0 : i32
    %c0_i32_2 = arith.constant 0 : i32
    return %c0_i32, %c0_i32_0, %c0_i32_1 : i32, i32, i32
  }
  func.func @transform_6(%arg0: i32, %arg1: i32) -> (i32, i32) {
    %c0_i32 = arith.constant 0 : i32
    %c0_i32_0 = arith.constant 0 : i32
    %c0_i32_1 = arith.constant 0 : i32
    return %c0_i32, %c0_i32_0 : i32, i32
  }
  func.func @transform_7(%arg0: i32, %arg1: i32) -> (i32, i32, i32) {
    %c1_i32 = arith.constant 1 : i32
    %0 = arith.muli %arg0, %c1_i32 : i32
    %1 = arith.addi %0, %arg1 : i32
    %c0_i32 = arith.constant 0 : i32
    %c0_i32_0 = arith.constant 0 : i32
    %c0_i32_1 = arith.constant 0 : i32
    return %1, %c0_i32, %c0_i32_0 : i32, i32, i32
  }
}

</mosaic_0001>

<bundles_post_ra>
// kernel: tpu_custom_call.1
= control target key start
LH: loop header
LB: loop body
LE: loop exit
PB: predicated region body
PF: predicated region fallthrough
CT: control target
= control target key end

     0   :  { %s3635_s0 = inlined_call_operand.vmem [shape: bf16[2,4,640], index: 0, kind: input, shape index: {}]   ;;  %s3636_s1 = inlined_call_operand.vmem [shape: bf16[2,4,640], index: 1, kind: input, shape index: {}]   ;;  %s3637_s2 = inlined_call_operand.hbm [shape: s32[2,578], index: 2, kind: input, shape index: {}]   ;;  %s3638_s3 = inlined_call_operand.vmem [shape: bf16[32,36], index: 3, kind: input, shape index: {}]   ;;  %s3639_s4 = inlined_call_operand.vmem [shape: f32[32,1], index: 4, kind: input, shape index: {}]   ;;  %s3640_s5 = inlined_call_operand.vmem [shape: bf16[9,1,32], index: 5, kind: input, shape index: {}]   ;;  %s3641_s6 = inlined_call_operand.<no memory space> [shape: f32[1,1], index: 6, kind: input, shape index: {}]   ;;  %s3642_s7 = inlined_call_operand.hbm [shape: f32[2,1,512], index: 7, kind: output, shape index: {}]  }
   0x1   :  { %v12_v0 = vstv %s3641_s6 }
   0x2   :  { %13 = vst [vmem:[#allocation2] sm:$0x1] %v12_v0 }
   0x3   :  { %14 = vsyncpa [#allocation4], 0 }
   0x4   :  { %15 = vsyncpa [#allocation5], 0 }
   0x5   :  { %17 = vsyncpa [#allocation5 + $0x1], 0  ;;  %s2604_s26 = smov 0   ;;  %s2606_s27 = smov 0  }
   0x6   :  { %s2608_s28 = smov 0   ;;  %s2610_s29 = smov 0  }
   0x7   :  { %s2612_s30 = smov 0   ;;  %s2614_s8 = smov 0  }
   0x8 LB: > { %s2241_s6 = sadd.s32 4294967295, %s2546_s8   ;;  %s2242_s9 = sadd.s32 4294967294, %s2546_s8   ;;  %s2546_s8 = sphi %s2614_s8, %s23_s8   ;;  %s2542_s30 = sphi %s2612_s30, %s3668_s30   ;;  %s2538_s29 = sphi %s2610_s29, %s3667_s29   ;;  %s2534_s28 = sphi %s2608_s28, %s3666_s28   ;;  %s2530_s27 = sphi %s2606_s27, %s3665_s27   ;;  %s2526_s26 = sphi %s2604_s26, %s3664_s26  }
   0x9   : > { %s35_s10 = sadd.s32 1, %s2542_s30  ;;  %s209_s11 = sadd.s32 1, %s2534_s28 }
   0xa   : > { %p37_p0 = scmp.ge.s32.totalorder %s35_s10, 2  ;;  %p219_p1 = scmp.ne.s32.totalorder %s2534_s28, %s2530_s27 }
   0xb   : > { %p220_p2 = scmp.eq.s32.totalorder %s2241_s6, 1  ;;  %p225_p3 = scmp.ne.s32.totalorder %s2530_s27, %s2526_s26 }
   0xc   : > { %s3670_s10 = smov (%p37_p0, %s35_s10), 0  ;;  %p226_p5 = scmp.eq.s32.totalorder %s2242_s9, 1 }
   0xd   : > { %p2644_p4 = por %p220_p2, %p219_p1  ;;  %s206_s13 = ssub.s32 %s2542_s30, %s3670_s10 }
   0xe   : > { %p2243_p6 = scmp.ge.s32.totalorder %s2546_s8, 1  ;;  %p207_p7 = scmp.eq.s32.totalorder %s206_s13, 0 }
   0xf   : > { %s3651_s12 = scalar_select %p2644_p4, 1, 0 }
  0x10   : > { %p2651_p8 = por %p226_p5, %p225_p3  ;;  %p233_p9 = scmp.lt.s32.totalorder %s2546_s8, 3 }
  0x11   : > { %s2657_s15 = scalar_select %p207_p7, %s2534_s28, %s209_s11  }
  0x12   : > { %s3652_s14 = scalar_select %p2651_p8, 1, 0 }
  0x13   : > { %p2659_p10 = pnand %p2243_p6, %p233_p9  ;;  %p2663_p11 = scmp.eq.s32.totalorder %s2241_s6, 0 }
  0x14   : > { %s2548_s18 = smov [#allocation3]   ;;  %s2436_s23 = scalar_lea.hbm %s3637_s2, 160 }
  0x15   : > { %s3653_s16 = scalar_select %p2659_p10, 1, 0 }
  0x16   : > { %s3654_s17 = scalar_select %p2663_p11, 1, 0 }
  0x17   : > { %p2343_p12 = pneg %p2659_p10  ;;  %s246_s19 = sshll.u32 %s2548_s18, 4  ;;  %s247_s19 = int_to_ptr.vmem [resolvable:$true] %s246_s19 }
  0x18   : > { %p2437_p0 = scmp.ne.s32.totalorder %s3637_s2, %s2436_s23  ;;  %p2443_p5 = scmp.lt.u32.totalorder %s2436_s23, %s3637_s2 }
  0x19   : > { %p2671_p13 = pnand %p2663_p11, %p2343_p12 }
  0x1b   : > { %p2438_p1 = pneg %p2671_p13 }
  0x1d   : > { %p2439_p2 = pnand %p2438_p1, %p2437_p0 }
  0x1f   : > { %p2440_p3 = pneg %p2439_p2 }
  0x21   : > { %p2445_p6 = pnand %p2443_p5, %p2440_p3 }
  0x23   : > { %2448 = shalt.err (!%p2445_p6)
}
  0x24   : > { %s2449_s11 = scalar_lea.vmem %s247_s19, 160  ;;  %p2457_p8 = scmp.lt.s32.totalorder %s247_s19, %s247_s19 }
  0x25   : > { %p2450_p7 = scmp.ne.s32.totalorder %s247_s19, %s2449_s11  ;;  %p2458_p4 = scmp.lt.s32.totalorder %s2449_s11, %s2449_s11 }
  0x27   : > { %p2452_p9 = pnand %p2450_p7, %p2438_p1  ;;  %p2459_p11 = por %p2458_p4, %p2457_p8 }
  0x29   : > { %p2453_p12 = pneg %p2452_p9 }
  0x2b   : > { %p2460_p10 = pnand %p2459_p11, %p2453_p12 }
  0x2d   : > { %2463 = shalt.err (!%p2460_p10)
}
  0x2e   : > { %2346 = dma.hbm_to_vmem [thread:$0]  (!%p2671_p13), %s3637_s2, 160, %s247_s19, [#allocation4]  }
  0x2f   : > { %p3656_p0 = scmp.ne.s32.totalorder %s3653_s16, 0 }
  0x30   : > { %p3657_p2 = scmp.ne.s32.totalorder (!%p3656_p0), %s3654_s17, 0 }
  0x31   : > { %307 = sbr.rel (%p3656_p0) target bundleno = 1034 (0x40a), region = 48 }
  0x38   : > { %2517 = dma.done.wait (%p3657_p2), [#allocation4], 160  }
  0x39   : > { %2519 = vsyncadd (%p3657_p2), [#allocation4], 4294967136  ;;  %p362_p4 = scmp.lt.s32.totalorder %s2538_s29, 1  ;;  %v396_v1 = vlaneseq  ;;  %v2549_v2 = vmov 1983009808   ;;  %v2550_v5 = vmov 0  }
  0x3a   : > { %v394_v3 = vunpack.c.l.s4 %v2549_v2  ;;  %745 = vmatprep.mubr.bf16.mxu0 %v2550_v5  ;;  %798 = vmatprep.mubr.bf16.mxu1 %v2550_v5  ;;  %s2551_s22 = smov 127   ;;  %s2552_s23 = smov 126   ;;  %v520_v28 = vrot.slane %v2550_v5, 2  ;;  %v501_v29 = vrot.slane %v2550_v5, 4  ;;  %v657_v30 = vld [vmem:[%s3639_s4] sm:$0xff]  ;;  %v659_v31 = vld [vmem:[%s3639_s4 + $0x10] sm:$0xff] }
  0x3b   : > { %s2699_s20 = scalar_select %p362_p4, %s2538_s29, 1  ;;  %v2702_v4 = vshrl.u32 %v396_v1, 7  ;;  %2416 = vset.pattern.permute.xlu0 %v2550_v5  ;;  %2415 = vset.pattern.permute.xlu1 %v2550_v5  ;;  %v658_v32 = vld [vmem:[%s3639_s4 + $0x8] sm:$0xff]  ;;  %v660_v33 = vld [vmem:[%s3639_s4 + $0x18] sm:$0xff]  ;;  %vm425_vm0 = vcmask 1039360   ;;  %vm445_vm1 = vcmask 1031168  }
  0x3c   : > { %v395_v6 = vunpack.c.0.s8 %v394_v3  ;;  %s2553_s24 = smov 96   ;;  %s2554_s25 = smov 95   ;;  %vm465_vm2 = vcmask 785408   ;;  %vm557_vm3 = vcmask 1041408   ;;  %vm584_vm4 = vcmask 1045504  }
  0x3d   : > { %s2335_s16 = smul.u32 10, %s2699_s20  ;;  %s2555_s6 = smov 94   ;;  %vm573_vm5 = vcmask 1043456   ;;  %vm495_vm6 = vcmask 769024   ;;  %vm480_vm7 = vcmask 777216   ;;  %vm514_vm8 = vcmask 523264  }
  0x3e   : > { %v398_v7 = vsub.s32 %v395_v6, %v2702_v4  ;;  %s3649_s9 = smov 64   ;;  %s3647_s13 = smov 63   ;;  %vm533_vm9 = vcmask 515072   ;;  %vm551_vm10 = vcmask 506880   ;;  %vm691_vm11 = vcmask 293888  }
  0x3f   : > { %s369_s21 = scalar_lea.vmem %s3635_s0, %s2335_s16  ;;  %s2317_s11 = sadd.s32 8, %s2335_s16 }
  0x40   : > { %v389_v8 = vld [vmem:[%s369_s21] sm:$0xff]  ;;  %s384_s19 = scalar_lea.vmem %s3636_s1, %s2317_s11  ;;  %s2558_s21 = smov 62  }
  0x41   : > { %v2715_v9 = vrot.slane %v389_v8, %v398_v7  ;;  %v392_v10 = vcombine.high %v389_v8, %v389_v8  ;;  %v2763_v21 = vld [vmem:[%s384_s19] sm:$0x3]  ;;  %s3658_s11 = smov 64   ;;  %s3659_s18 = smov 63  }
  0x42   : > { %v414_v23 = vrot.slane %v2763_v21, 6  ;;  %v434_v25 = vrot.slane %v2763_v21, 4  ;;  %v454_v26 = vrot.slane %v2763_v21, 2  ;;  %s2318_s17 = sshll.u32 %s2538_s29, 6  ;;  %p3662_p10 = scmp.ne.s32.totalorder %s3651_s12, 0 }
  0x43   : > { %v410_v11 = vrot.slane %v2715_v9, 6  ;;  %v2720_v12 = vcombine.high %v2715_v9, %v2715_v9  ;;  %v2722_v13 = vrot.slane %v392_v10, %v398_v7  ;;  %v430_v16 = vrot.slane %v2715_v9, 4  ;;  %s3588_s16 = scalar_lea.hbm %s3642_s7, %s2318_s17  ;;  %s2560_s29 = smov [#allocation6]  }
  0x44   : > { %v450_v20 = vrot.slane %v2715_v9, 2 }
  0x45   : > { %415 = vrot.lane.b32.xlu1 %v410_v11, %s2551_s22  ;;  %v411_v14 = vrot.slane %v2720_v12, 6  ;;  %v412_v15 = vrot.slane %v2722_v13, 6  ;;  %v432_v17 = vrot.slane %v2722_v13, 4  ;;  %v452_v18 = vrot.slane %v2722_v13, 2 }
  0x46   : > { %v451_v19 = vrot.slane %v2720_v12, 2  ;;  %v2768_v22 = vcombine.high %v2722_v13, %v2722_v13 }
  0x47   : > { %417 = vrot.lane.b32.xlu0 %v411_v14, %s2551_s22 }
  0x48   : > { %v413_v24 = vrot.slane %v2768_v22, 6  ;;  %v453_v27 = vrot.slane %v2768_v22, 2 }
  0x49   : > { %437 = vrot.lane.b32.xlu1 %v2720_v12, %s2552_s23 }
  0x4b   : > { %419 = vrot.lane.b32.xlu0 %v412_v15, %s2551_s22 }
  0x4d   : > { %435 = vrot.lane.b32.xlu1 %v430_v16, %s2552_s23 }
  0x4f   : > { %439 = vrot.lane.b32.xlu0 %v432_v17, %s2552_s23 }
  0x51   : > { %459 = vrot.lane.b32.xlu1 %v452_v18, %s2553_s24 }
  0x53   : > { %457 = vrot.lane.b32.xlu0 %v451_v19, %s2553_s24 }
  0x55   : > { %472 = vrot.lane.b32.xlu1 %v2720_v12, %s2554_s25 }
  0x57   : > { %455 = vrot.lane.b32.xlu0 %v450_v20, %s2553_s24 }
  0x59   : > { %487 = vrot.lane.b32.xlu1 %v411_v14, %s2555_s6 }
  0x5b   : > { %474 = vrot.lane.b32.xlu0 %v2722_v13, %s2554_s25 }
  0x5d   : > { %470 = vrot.lane.b32.xlu1 %v2715_v9, %s2554_s25 }
  0x5f   : > { %489 = vrot.lane.b32.xlu0 %v412_v15, %s2555_s6 }
  0x61   : > { %504 = vrot.lane.b32.xlu1 %v2720_v12, %s3649_s9 }
  0x63   : > { %485 = vrot.lane.b32.xlu0 %v410_v11, %s2555_s6 }
  0x65   : > { %502 = vrot.lane.b32.xlu1 %v430_v16, %s3649_s9 }
  0x67   : > { %506 = vrot.lane.b32.xlu0 %v432_v17, %s3649_s9 }
  0x69   : > { %525 = vrot.lane.b32.xlu1 %v452_v18, %s3647_s13 }
  0x6b   : > { %523 = vrot.lane.b32.xlu0 %v451_v19, %s3647_s13 }
  0x6d   : > { %539 = vrot.lane.b32.xlu1 %v2715_v9, %s2558_s21 }
  0x6f   : > { %521 = vrot.lane.b32.xlu0 %v450_v20, %s3647_s13 }
  0x71   : > { %543 = vrot.lane.b32.xlu1 %v2722_v13, %s2558_s21 }
  0x73   : > { %541 = vrot.lane.b32.xlu0 %v2720_v12, %s2558_s21 }
  0x75   : > { %423 = vrot.lane.b32.xlu1 %v414_v23, %s2551_s22 }
  0x77   : > { %421 = vrot.lane.b32.xlu0 %v413_v24, %s2551_s22 }
  0x79   : > { %443 = vrot.lane.b32.xlu1 %v434_v25, %s2552_s23 }
  0x7b   : > { %441 = vrot.lane.b32.xlu0 %v2768_v22, %s2552_s23 }
  0x7d   : > { %463 = vrot.lane.b32.xlu1 %v454_v26, %s2553_s24 }
  0x7f   : > { %461 = vrot.lane.b32.xlu0 %v453_v27, %s2553_s24 }
  0x81   : > { %478 = vrot.lane.b32.xlu1 %v2763_v21, %s2554_s25 }
  0x83   : > { %476 = vrot.lane.b32.xlu0 %v2768_v22, %s2554_s25 }
  0x85   : > { %493 = vrot.lane.b32.xlu1 %v414_v23, %s2555_s6 }
  0x87   : > { %491 = vrot.lane.b32.xlu0 %v413_v24, %s2555_s6 }
  0x89   : > { %510 = vrot.lane.b32.xlu1 %v434_v25, %s3649_s9 }
  0x8b   : > { %508 = vrot.lane.b32.xlu0 %v2768_v22, %s3649_s9 }
  0x8d   : > { %529 = vrot.lane.b32.xlu1 %v454_v26, %s3647_s13 }
  0x8f   : > { %527 = vrot.lane.b32.xlu0 %v453_v27, %s3647_s13 }
  0x91   : > { %531 = vrot.lane.b32.xlu1 %v520_v28, %s3647_s13 }
  0x93   : > { %512 = vrot.lane.b32.xlu0 %v501_v29, %s3649_s9 }
  0x95   : > { %547 = vrot.lane.b32.xlu1 %v2763_v21, %s2558_s21 }
  0x97   : > { %545 = vrot.lane.b32.xlu0 %v2768_v22, %s2558_s21 }
  0x99   : > { %663 = vperm.xlu1 %2415, %v657_v30   ;;  %v2878_v30 = vld [vmem:[%s3638_s3] sm:$0xff]  }
  0x9b   : > { %549 = vrot.lane.b32.xlu0 %v2550_v5, %s2558_s21 }
  0x9d   : > { %673 = vperm.xlu1 %2415, %v659_v31  }
  0x9f   : > { %668 = vperm.xlu0 %2416, %v658_v32  }
  0xa1   : > { %678 = vperm.xlu1 %2415, %v660_v33  }
  0xb7   : > { %v416_v34 = vpop.permute.xlu1 %415 }
  0xb9   : > { %v418_v35 = vpop.permute.xlu0 %417 }
  0xba   : > { %v426_v45 = vsel %vm425_vm0, %v416_v34, %v418_v35 }
  0xbb   : > { %v438_v36 = vpop.permute.xlu1 %437  ;;  %v560_v52 = vsel %vm557_vm3, %v2715_v9, %v426_v45 }
  0xbd   : > { %v2819_v37 = vpop.permute.xlu0 %419 }
  0xbe   : > { %v427_v40 = vsel %vm425_vm0, %v418_v35, %v2819_v37 }
  0xbf   : > { %v436_v38 = vpop.permute.xlu1 %435  ;;  %v563_v44 = vsel %vm557_vm3, %v2720_v12, %v427_v40 }
  0xc0   : > { %v446_v48 = vsel %vm445_vm1, %v436_v38, %v438_v36 }
  0xc1   : > { %v2821_v39 = vpop.permute.xlu0 %439  ;;  %v575_v54 = vsel %vm573_vm5, %v560_v52, %v446_v48 }
  0xc2   : > { %v447_v41 = vsel %vm445_vm1, %v438_v36, %v2821_v39 }
  0xc3   : > { %v2827_v42 = vpop.permute.xlu1 %459  ;;  %v577_v47 = vsel %vm573_vm5, %v563_v44, %v447_v41 }
  0xc5   : > { %v458_v43 = vpop.permute.xlu0 %457 }
  0xc6   : > { %v467_v46 = vsel %vm465_vm2, %v458_v43, %v2827_v42 }
  0xc7   : > { %v473_v49 = vpop.permute.xlu1 %472  ;;  %v589_v50 = vsel %vm584_vm4, %v577_v47, %v467_v46 }
  0xc8   : > { %713 = vmatprep.subr.bf16.mxu0 %v589_v50 }
  0xc9   : > { %v456_v51 = vpop.permute.xlu0 %455 }
  0xca   : > { %v466_v53 = vsel %vm465_vm2, %v456_v51, %v458_v43 }
  0xcb   : > { %v488_v55 = vpop.permute.xlu1 %487  ;;  %v586_v56 = vsel %vm584_vm4, %v575_v54, %v466_v53 }
  0xcc   : > { %714 = vmatpush1.bf16.msra.mxu0 %v586_v56 }
  0xcd   : > { %v2842_v57 = vpop.permute.xlu0 %474 }
  0xce   : > { %v482_v6 = vsel %vm480_vm7, %v473_v49, %v2842_v57 }
  0xcf   : > { %v471_v58 = vpop.permute.xlu1 %470 }
  0xd0   : > { %v481_v10 = vsel %vm480_vm7, %v471_v58, %v473_v49 }
  0xd1   : > { %v2844_v59 = vpop.permute.xlu0 %489 }
  0xd2   : > { %v497_v0 = vsel %vm495_vm6, %v488_v55, %v2844_v59 }
  0xd3   : > { %v505_v60 = vpop.permute.xlu1 %504  ;;  %v605_v8 = vsel %vm557_vm3, %v482_v6, %v497_v0 }
  0xd5   : > { %v486_v61 = vpop.permute.xlu0 %485 }
  0xd6   : > { %v496_v7 = vsel %vm495_vm6, %v486_v61, %v488_v55 }
  0xd7   : > { %v503_v62 = vpop.permute.xlu1 %502  ;;  %v602_v14 = vsel %vm557_vm3, %v481_v10, %v496_v7 }
  0xd8   : > { %v515_v15 = vsel %vm514_vm8, %v503_v62, %v505_v60 }
  0xd9   : > { %v2846_v63 = vpop.permute.xlu0 %506  ;;  %v616_v20 = vsel %vm573_vm5, %v602_v14, %v515_v15 }
  0xda   : > { %v516_v2 = vsel %vm514_vm8, %v505_v60, %v2846_v63 }
  0xdb   : > { %v2852_v3 = vpop.permute.xlu1 %525  ;;  %v618_v12 = vsel %vm573_vm5, %v605_v8, %v516_v2 }
  0xdd   : > { %v524_v9 = vpop.permute.xlu0 %523 }
  0xde   : > { %v535_v11 = vsel %vm533_vm9, %v524_v9, %v2852_v3 }
  0xdf   : > { %v540_v16 = vpop.permute.xlu1 %539  ;;  %v629_v17 = vsel %vm584_vm4, %v618_v12, %v535_v11 }
  0xe0   : > { %715 = vmatprep.subr.bf16.mxu0 %v629_v17 }
  0xe1   : > { %v522_v18 = vpop.permute.xlu0 %521 }
  0xe2   : > { %v534_v19 = vsel %vm533_vm9, %v522_v18, %v524_v9 }
  0xe3   : > { %v2867_v23 = vpop.permute.xlu1 %543  ;;  %v626_v24 = vsel %vm584_vm4, %v616_v20, %v534_v19 }
  0xe4   : > { %716 = vmatpush1.bf16.msra.mxu0 %v626_v24 }
  0xe5   : > { %v542_v25 = vpop.permute.xlu0 %541 }
  0xe6   : > { %v553_v26 = vsel %vm551_vm10, %v542_v25, %v2867_v23  ;;  %v552_v27 = vsel %vm551_vm10, %v540_v16, %v542_v25 }
  0xe7   : > { %v424_v28 = vpop.permute.xlu1 %423  ;;  %2253 = vmatprep.subr.msk.bf16.mxu0 %vm557_vm3, %v553_v26  ;;  %v699_v29 = vsel %vm557_vm3, %v552_v27, 0 }
  0xe8   : > { %718 = vmatpush1.bf16.msra.mxu0 %v699_v29  ;;  %v572_v33 = vsel %vm557_vm3, %v2763_v21, %v424_v28  ;;  %v2895_v21 = vld [vmem:[%s3638_s3 + $0x8] sm:$0xff]  }
  0xe9   : > { %v422_v31 = vpop.permute.xlu0 %421  ;;  %v646_v29 = vld [vmem:[#allocation3 + $0x1] ss:$2 sm:$0x1f] }
  0xea   : > { %v428_v35 = vsel %vm425_vm0, %v2819_v37, %v422_v31  ;;  %v429_v36 = vsel %vm425_vm0, %v422_v31, %v424_v28  ;;  %vm655_vm15 = vcmp.gt.s32.totalorder %v646_v29, 0 }
  0xeb   : > { %v444_v32 = vpop.permute.xlu1 %443  ;;  %2254 = vmatmul.mubr.msk.bf16.vlgmr.msra.gmra.mrb[0].mxu0 %vm691_vm11, %v2878_v30  ;;  %v569_v37 = vsel %vm557_vm3, %v2768_v22, %v429_v36  ;;  %v566_v46 = vsel %vm557_vm3, %v2722_v13, %v428_v35 }
  0xec   : > { %755 = vmatprep.mubr.bf16.mxu0 %v2550_v5  ;;  %v583_v38 = vsel %vm573_vm5, %v572_v33, %v444_v32 }
  0xed   : > { %v442_v34 = vpop.permute.xlu0 %441 }
  0xee   : > { %v448_v40 = vsel %vm445_vm1, %v2821_v39, %v442_v34  ;;  %v449_v41 = vsel %vm445_vm1, %v442_v34, %v444_v32  ;;  %v895_v32 = vsub.s32 1, %v2702_v4 }
  0xef   : > { %v464_v43 = vpop.permute.xlu1 %463  ;;  %v581_v47 = vsel %vm573_vm5, %v569_v37, %v449_v41  ;;  %v579_v49 = vsel %vm573_vm5, %v566_v46, %v448_v40 }
  0xf0   : > { %v598_v44 = vsel %vm584_vm4, %v583_v38, %v464_v43 }
  0xf1   : > { %2324 = vmatprep.subr.bf16.mxu0 %v598_v44  ;;  %v462_v45 = vpop.permute.xlu0 %461 }
  0xf2   : > { %2325 = vmatpush3.bf16.msra.mxu0 %v598_v44  ;;  %v469_v39 = vsel %vm465_vm2, %v462_v45, %v464_v43  ;;  %v468_v48 = vsel %vm465_vm2, %v2827_v42, %v462_v45 }
  0xf3   : > { %v479_v50 = vpop.permute.xlu1 %478  ;;  %v595_v51 = vsel %vm584_vm4, %v581_v47, %v469_v39  ;;  %v592_v52 = vsel %vm584_vm4, %v579_v49, %v468_v48  ;;  %2255 = vmatmul.mubr.msk.bf16.gmra.mrb[4].mxu0 %vm691_vm11, %v2895_v21 }
  0xf4   : > { %766 = vmatprep.subr.bf16.mxu1 %v595_v51  ;;  %2330 = vmatprep.mubr.msk.bf16.mxu0 %vm691_vm11, %v2878_v30 }
  0xf5   : > { %767 = vmatpush1.bf16.msra.mxu1 %v592_v52  ;;  %v477_v13 = vpop.permute.xlu0 %476 }
  0xf6   : > { %v483_v62 = vsel %vm480_vm7, %v2842_v57, %v477_v13  ;;  %v484_v0 = vsel %vm480_vm7, %v477_v13, %v479_v50 }
  0xf7   : > { %v494_v22 = vpop.permute.xlu1 %493 }
  0xf8   : > { %v614_v14 = vsel %vm557_vm3, %v479_v50, %v494_v22 }
  0xf9   : > { %v492_v53 = vpop.permute.xlu0 %491 }
  0xfa   : > { %v498_v55 = vsel %vm495_vm6, %v2844_v59, %v492_v53  ;;  %v499_v56 = vsel %vm495_vm6, %v492_v53, %v494_v22 }
  0xfb   : > { %v511_v54 = vpop.permute.xlu1 %510  ;;  %v608_v2 = vsel %vm557_vm3, %v483_v62, %v498_v55  ;;  %v611_v6 = vsel %vm557_vm3, %v484_v0, %v499_v56 }
  0xfd   : > { %v509_v42 = vpop.permute.xlu0 %508 }
  0xfe   : > { %v517_v58 = vsel %vm514_vm8, %v2846_v63, %v509_v42  ;;  %v518_v60 = vsel %vm514_vm8, %v509_v42, %v511_v54 }
  0xff   : > { %v530_v61 = vpop.permute.xlu1 %529  ;;  %v622_v63 = vsel %vm573_vm5, %v611_v6, %v518_v60  ;;  %v620_v9 = vsel %vm573_vm5, %v608_v2, %v517_v58 }
 0x101   : > { %v528_v7 = vpop.permute.xlu0 %527 }
 0x102   : > { %v536_v59 = vsel %vm533_vm9, %v2852_v3, %v528_v7  ;;  %v537_v8 = vsel %vm533_vm9, %v528_v7, %v530_v61 }
 0x103   : > { %v532_v10 = vpop.permute.xlu1 %531  ;;  %v635_v11 = vsel %vm584_vm4, %v622_v63, %v537_v8  ;;  %v632_v57 = vsel %vm584_vm4, %v620_v9, %v536_v59 }
 0x104   : > { %768 = vmatprep.subr.bf16.mxu1 %v635_v11  ;;  %v538_v3 = vsel %vm533_vm9, %v530_v61, %v532_v10 }
 0x105   : > { %769 = vmatpush1.bf16.msra.mxu1 %v632_v57  ;;  %v513_v12 = vpop.permute.xlu0 %512 }
 0x106   : > { %v519_v15 = vsel %vm514_vm8, %v511_v54, %v513_v12 }
 0x107   : > { %v548_v16 = vpop.permute.xlu1 %547  ;;  %v624_v17 = vsel %vm573_vm5, %v614_v14, %v519_v15 }
 0x108   : > { %v638_v18 = vsel %vm584_vm4, %v624_v17, %v538_v3  ;;  %v903_v17 = vsub.s32 3, %v2702_v4 }
 0x109   : > { %2326 = vmatprep.subr.bf16.mxu0 %v638_v18  ;;  %v546_v19 = vpop.permute.xlu0 %545 }
 0x10a   : > { %v554_v20 = vsel %vm551_vm10, %v2867_v23, %v546_v19  ;;  %v555_v24 = vsel %vm551_vm10, %v546_v19, %v548_v16  ;;  %2327 = vmatpush3.bf16.msra.mxu0 %v638_v18  ;;  %v644_v23 = vld [vmem:[#allocation3] ss:$2 sm:$0x1f]  ;;  %v907_v18 = vsub.s32 4, %v2702_v4 }
 0x10b   : > { %2256 = vmatprep.subr.msk.bf16.mxu1 %vm557_vm3, %v555_v24  ;;  %v705_v25 = vsel %vm557_vm3, %v554_v20, 0  ;;  %vm651_vm12 = vcmp.ge.s32.totalorder %v644_v23, 1  ;;  %vm653_vm13 = vcmp.lt.s32.totalorder %v644_v23, 17 }
 0x10c   : > { %771 = vmatpush1.bf16.msra.mxu1 %v705_v25  ;;  %vm654_vm14 = vmand %vm651_vm12, %vm653_vm13 }
 0x10d   : > { %v550_v26 = vpop.permute.xlu0 %549 }
 0x10e   : > { %v556_v27 = vsel %vm551_vm10, %v548_v16, %v550_v26  ;;  %v899_v16 = vsub.s32 2, %v2702_v4 }
 0x10f   : > { %v711_v28 = vsel %vm557_vm3, %v556_v27, 0  ;;  %2257 = vmatmul.mubr.msk.bf16.vlgmr.msra.gmra.mrb[0].mxu1 %vm691_vm11, %v2878_v30  ;;  %2334 = vmatprep.subr.msk.bf16.mxu0 %vm557_vm3, %v556_v27  ;;  %vm656_vm3 = vmand %vm654_vm14, %vm655_vm15  ;;  %v891_v30 = vsub.s32 0, %v2702_v4  ;;  %vm993_vm15 = vcmask 261120  }
 0x110   : > { %2329 = vmatpush3.bf16.msra.mxu0 %v711_v28  ;;  %808 = vmatprep.mubr.bf16.mxu1 %v2550_v5  ;;  %v2955_v31 = vsel %vm656_vm3, 1, %v2550_v5 }
 0x111   : > { %v2961_v33 = vrot.slane %v2955_v31, %v891_v30  ;;  %v2966_v35 = vrot.slane %v2955_v31, %v895_v32  ;;  %v3034_v19 = vrot.slane %v2955_v31, %v899_v16  ;;  %v3037_v20 = vrot.slane %v2955_v31, %v903_v17 }
 0x112   : > { %v908_v27 = vrot.slane %v2955_v31, %v907_v18 }
 0x113   : > { %2331 = vmatmul.mubr.msk.bf16.vlgmr.msra.gmra.mrb[8].mxu0 %vm691_vm11, %v2895_v21  ;;  %vm909_vm4 = vcmp.eq.s32.totalorder %v2961_v33, 1  ;;  %vm910_vm5 = vcmp.eq.s32.totalorder %v2966_v35, 1  ;;  %vm912_vm12 = vcmp.eq.s32.totalorder %v3037_v20, 1 }
 0x114   : > { %1070 = vmatprep.mubr.bf16.mxu0 %v2550_v5  ;;  %vm913_vm13 = vcmp.eq.s32.totalorder %v908_v27, 1  ;;  %vm2264_vm14 = vmpackc.low %vm910_vm5, %vm910_vm5 }
 0x115   : > { %vm2267_vm3 = vmpackc.low %vm909_vm4, %vm909_vm4 }
 0x117   : > { %2258 = vmatmul.mubr.msk.bf16.gmra.mrb[4].mxu1 %vm691_vm11, %v2895_v21  ;;  %vm911_vm11 = vcmp.eq.s32.totalorder %v3034_v19, 1 }
 0x118   : > { %1029 = vmatprep.mubr.bf16.mxu1 %v2550_v5  ;;  %v2963_v34 = vpop.permute.xlu1 %663 }
 0x11c   : > { %v2973_v44 = vpop.permute.xlu1 %673 }
 0x11e   : > { %v2968_v38 = vpop.permute.xlu0 %668 }
 0x120   : > { %v2992_v55 = vpop.permute.xlu1 %678 }
 0x1be   : > { %v747_v36 = vpop.f32.mrb[0].mxu0 }
 0x1bf   : > { %v749_v40 = vpop.f32.mrb[1].mxu0  ;;  %v748_v41 = vadd.f32 %v747_v36, %v2963_v34 }
 0x1c0   : > { %v751_v43 = vpop.f32.mrb[2].mxu0  ;;  %v750_v21 = vadd.f32 %v749_v40, %v2963_v34 }
 0x1c1   : > { %v868_v45 = vmax.f32 %v748_v41, 0.0  ;;  %v752_v37 = vadd.f32 %v751_v43, %v2968_v38  ;;  %v753_v46 = vpop.f32.mrb[3].mxu0 }
 0x1c2   : > { %v754_v39 = vadd.f32 %v753_v46, %v2968_v38  ;;  %v869_v47 = vmax.f32 %v750_v21, 0.0 }
 0x1c3   : > { %v914_v48 = vsel %vm909_vm4, %v868_v45, 0.0  ;;  %v873_v49 = vmax.f32 %v752_v37, 0.0 }
 0x1c4   : > { %v874_v50 = vmax.f32 %v754_v39, 0.0  ;;  %v915_v51 = vsel %vm910_vm5, %v869_v47, 0.0 }
 0x1c5   : > { %v919_v52 = vsel %vm909_vm4, %v873_v49, 0.0  ;;  %v2984_v13 = vpack.c.bf16 %v873_v49, %v868_v45 }
 0x1c6   : > { %v2986_v22 = vpack.c.bf16 %v919_v52, %v914_v48  ;;  %v920_v53 = vsel %vm910_vm5, %v874_v50, 0.0  ;;  %v2990_v54 = vpack.c.bf16 %v874_v50, %v869_v47  ;;  %v757_v42 = vpop.f32.mrb[4].mxu0 }
 0x1c7   : > { %v2994_v56 = vpack.c.bf16 %v920_v53, %v915_v51  ;;  %v758_v58 = vadd.f32 %v757_v42, %v2973_v44  ;;  %v759_v60 = vpop.f32.mrb[5].mxu0 }
 0x1c8   : > { %957 = vrot.lane.b32.xlu0 %v2986_v22, %s2551_s22  ;;  %v760_v61 = vadd.f32 %v759_v60, %v2973_v44  ;;  %v761_v62 = vpop.f32.mrb[6].mxu0 }
 0x1c9   : > { %v878_v0 = vmax.f32 %v758_v58, 0.0  ;;  %v762_v2 = vadd.f32 %v761_v62, %v2992_v55  ;;  %v763_v6 = vpop.f32.mrb[7].mxu0 }
 0x1ca   : > { %v879_v7 = vmax.f32 %v760_v61, 0.0  ;;  %v764_v59 = vadd.f32 %v763_v6, %v2992_v55 }
 0x1cb   : > { %v924_v8 = vsel %vm909_vm4, %v878_v0, 0.0  ;;  %v883_v63 = vmax.f32 %v762_v2, 0.0 }
 0x1cc   : > { %1166 = vrot.lane.b32.xlu0 %v2986_v22, %s2552_s23  ;;  %v925_v9 = vsel %vm910_vm5, %v879_v7, 0.0  ;;  %v884_v10 = vmax.f32 %v764_v59, 0.0 }
 0x1cd   : > { %v929_v11 = vsel %vm909_vm4, %v883_v63, 0.0  ;;  %v3010_v57 = vpack.c.bf16 %v883_v63, %v878_v0  ;;  %vm3429_vm4 = vmpackc.low %vm912_vm12, %vm912_vm12 }
 0x1ce   : > { %v3012_v12 = vpack.c.bf16 %v929_v11, %v924_v8  ;;  %v930_v14 = vsel %vm910_vm5, %v884_v10, 0.0  ;;  %v3016_v15 = vpack.c.bf16 %v884_v10, %v879_v7 }
 0x1cf   : > { %v3018_v3 = vpack.c.bf16 %v930_v14, %v925_v9 }
 0x1d0   : > { %1293 = vrot.lane.b32.xlu0 %v2986_v22, %s2553_s24 }
 0x1d4   : > { %1420 = vrot.lane.b32.xlu0 %v2986_v22, %s2554_s25 }
 0x1d8   : > { %1547 = vrot.lane.b32.xlu0 %v2986_v22, %s2555_s6 }
 0x1dc   : > { %1674 = vrot.lane.b32.xlu0 %v2986_v22, %s3658_s11 }
 0x1e0   : > { %959 = vrot.lane.b32.xlu0 %v2994_v56, %s2551_s22 }
 0x1e2   : > { %v800_v24 = vpop.f32.mrb[0].mxu1 }
 0x1e3   : > { %v801_v25 = vadd.f32 %v800_v24, %v2963_v34  ;;  %v802_v26 = vpop.f32.mrb[1].mxu1 }
 0x1e4   : > { %v803_v28 = vadd.f32 %v802_v26, %v2963_v34  ;;  %v804_v23 = vpop.f32.mrb[2].mxu1  ;;  %1168 = vrot.lane.b32.xlu0 %v2994_v56, %s2552_s23 }
 0x1e5   : > { %v870_v29 = vmax.f32 %v801_v25, 0.0  ;;  %v805_v32 = vadd.f32 %v804_v23, %v2968_v38  ;;  %v806_v36 = vpop.f32.mrb[3].mxu1 }
 0x1e6   : > { %v871_v40 = vmax.f32 %v803_v28, 0.0  ;;  %v807_v41 = vadd.f32 %v806_v36, %v2968_v38  ;;  %v2332_v43 = vpop.f32.mrb[8].mxu0 }
 0x1e7   : > { %v875_v21 = vmax.f32 %v805_v32, 0.0  ;;  %v862_v31 = vadd.f32 %v2332_v43, %v2973_v44  ;;  %v853_v45 = vpop.f32.mrb[9].mxu0  ;;  %v916_v37 = vsel %vm911_vm11, %v870_v29, 0.0 }
 0x1e8   : > { %v917_v46 = vsel %vm912_vm12, %v871_v40, 0.0  ;;  %v876_v39 = vmax.f32 %v807_v41, 0.0  ;;  %v854_v47 = vadd.f32 %v853_v45, %v2963_v34  ;;  %v2333_v48 = vpop.f32.mrb[10].mxu0  ;;  %1295 = vrot.lane.b32.xlu0 %v2994_v56, %s2553_s24 }
 0x1e9   : > { %v921_v49 = vsel %vm911_vm11, %v875_v21, 0.0  ;;  %v3058_v50 = vpack.c.bf16 %v875_v21, %v870_v29  ;;  %v882_v51 = vmax.f32 %v862_v31, 0.0  ;;  %v865_v52 = vadd.f32 %v2333_v48, %v2992_v55  ;;  %v856_v53 = vpop.f32.mrb[11].mxu0 }
 0x1ea   : > { %v3061_v42 = vpack.c.bf16 %v921_v49, %v916_v37  ;;  %v922_v58 = vsel %vm912_vm12, %v876_v39, 0.0  ;;  %v3065_v60 = vpack.c.bf16 %v876_v39, %v871_v40  ;;  %v872_v34 = vmax.f32 %v854_v47, 0.0  ;;  %v810_v61 = vpop.f32.mrb[4].mxu1 }
 0x1eb   : > { %v3067_v62 = vpack.c.bf16 %v922_v58, %v917_v46  ;;  %v928_v0 = vsel %vm913_vm13, %v882_v51, 0.0  ;;  %v887_v2 = vmax.f32 %v865_v52, 0.0  ;;  %v857_v6 = vadd.f32 %v856_v53, %v2968_v38  ;;  %v812_v7 = vpop.f32.mrb[5].mxu1 }
 0x1ec   : > { %v918_v59 = vsel %vm913_vm13, %v872_v34, 0.0  ;;  %v811_v8 = vadd.f32 %v810_v61, %v2973_v44  ;;  %v813_v63 = vadd.f32 %v812_v7, %v2973_v44  ;;  %v814_v9 = vpop.f32.mrb[6].mxu1  ;;  %961 = vrot.lane.b32.xlu1 %v3061_v42, %s2551_s22  ;;  %1422 = vrot.lane.b32.xlu0 %v2994_v56, %s2554_s25  ;;  %v2053_v61 = vld [vmem:[#allocation2] sm:$0x1] }
 0x1ed   : > { %v933_v10 = vsel %vm913_vm13, %v887_v2, 0.0  ;;  %v877_v11 = vmax.f32 %v857_v6, 0.0  ;;  %v815_v14 = vadd.f32 %v814_v9, %v2992_v55  ;;  %v816_v38 = vpop.f32.mrb[7].mxu1 }
 0x1ee   : > { %v3080_v16 = vpack.c.bf16 %v933_v10, %v928_v0  ;;  %v880_v17 = vmax.f32 %v811_v8, 0.0  ;;  %v881_v18 = vmax.f32 %v813_v63, 0.0  ;;  %v817_v24 = vadd.f32 %v816_v38, %v2992_v55 }
 0x1ef   : > { %v923_v44 = vsel %vm913_vm13, %v877_v11, 0.0  ;;  %v885_v25 = vmax.f32 %v815_v14, 0.0 }
 0x1f0   : > { %v3084_v26 = vpack.c.bf16 %v923_v44, %v918_v59  ;;  %v886_v28 = vmax.f32 %v817_v24, 0.0  ;;  %1170 = vrot.lane.b32.xlu1 %v3061_v42, %s2552_s23  ;;  %1549 = vrot.lane.b32.xlu0 %v2994_v56, %s2555_s6  ;;  %v926_v23 = vsel %vm911_vm11, %v880_v17, 0.0  ;;  %v927_v55 = vsel %vm912_vm12, %v881_v18, 0.0 }
 0x1f1   : > { %v931_v29 = vsel %vm911_vm11, %v885_v25, 0.0  ;;  %v3094_v32 = vpack.c.bf16 %v885_v25, %v880_v17 }
 0x1f2   : > { %v3098_v27 = vpack.c.bf16 %v931_v29, %v926_v23  ;;  %v932_v36 = vsel %vm912_vm12, %v886_v28, 0.0  ;;  %v3102_v40 = vpack.c.bf16 %v886_v28, %v881_v18 }
 0x1f3   : > { %v3104_v41 = vpack.c.bf16 %v932_v36, %v927_v55  ;;  %v3314_v55 = vld [vmem:[%s3640_s5 + $0x1] sm:$0x1] }
 0x1f4   : > { %1297 = vrot.lane.b32.xlu1 %v3061_v42, %s2553_s24  ;;  %1676 = vrot.lane.b32.xlu0 %v2994_v56, %s3658_s11 }
 0x1f8   : > { %1424 = vrot.lane.b32.xlu1 %v3061_v42, %s2554_s25  ;;  %963 = vrot.lane.b32.xlu0 %v3067_v62, %s2551_s22 }
 0x1fc   : > { %1551 = vrot.lane.b32.xlu1 %v3061_v42, %s2555_s6  ;;  %1172 = vrot.lane.b32.xlu0 %v3067_v62, %s2552_s23 }
 0x200   : > { %1678 = vrot.lane.b32.xlu1 %v3061_v42, %s3658_s11  ;;  %1299 = vrot.lane.b32.xlu0 %v3067_v62, %s2553_s24 }
 0x204   : > { %967 = vrot.lane.b32.xlu1 %v3012_v12, %s2551_s22  ;;  %1426 = vrot.lane.b32.xlu0 %v3067_v62, %s2554_s25 }
 0x208   : > { %1176 = vrot.lane.b32.xlu1 %v3012_v12, %s2552_s23  ;;  %1553 = vrot.lane.b32.xlu0 %v3067_v62, %s2555_s6 }
 0x20c   : > { %1303 = vrot.lane.b32.xlu1 %v3012_v12, %s2553_s24  ;;  %1680 = vrot.lane.b32.xlu0 %v3067_v62, %s3658_s11 }
 0x210   : > { %1430 = vrot.lane.b32.xlu1 %v3012_v12, %s2554_s25  ;;  %971 = vrot.lane.b32.xlu0 %v3098_v27, %s2551_s22 }
 0x214   : > { %1557 = vrot.lane.b32.xlu1 %v3012_v12, %s2555_s6  ;;  %1180 = vrot.lane.b32.xlu0 %v3098_v27, %s2552_s23 }
 0x218   : > { %969 = vrot.lane.b32.xlu1 %v3018_v3, %s2551_s22  ;;  %1307 = vrot.lane.b32.xlu0 %v3098_v27, %s2553_s24 }
 0x21c   : > { %1178 = vrot.lane.b32.xlu1 %v3018_v3, %s2552_s23  ;;  %1434 = vrot.lane.b32.xlu0 %v3098_v27, %s2554_s25 }
 0x220   : > { %1305 = vrot.lane.b32.xlu1 %v3018_v3, %s2553_s24  ;;  %1561 = vrot.lane.b32.xlu0 %v3098_v27, %s2555_s6 }
 0x224   : > { %1432 = vrot.lane.b32.xlu1 %v3018_v3, %s2554_s25  ;;  %975 = vrot.lane.b32.xlu0 %v3080_v16, %s2551_s22 }
 0x228   : > { %1559 = vrot.lane.b32.xlu1 %v3018_v3, %s2555_s6  ;;  %1184 = vrot.lane.b32.xlu0 %v3080_v16, %s2552_s23 }
 0x22c   : > { %973 = vrot.lane.b32.xlu1 %v3104_v41, %s2551_s22  ;;  %1311 = vrot.lane.b32.xlu0 %v3080_v16, %s2553_s24 }
 0x230   : > { %1182 = vrot.lane.b32.xlu1 %v3104_v41, %s2552_s23  ;;  %1438 = vrot.lane.b32.xlu0 %v3080_v16, %s2554_s25 }
 0x234   : > { %1309 = vrot.lane.b32.xlu1 %v3104_v41, %s2553_s24  ;;  %1565 = vrot.lane.b32.xlu0 %v3080_v16, %s2555_s6 }
 0x238   : > { %1436 = vrot.lane.b32.xlu1 %v3104_v41, %s2554_s25  ;;  %1688 = vrot.lane.b32.xlu0 %v3098_v27, %s3658_s11 }
 0x23a   : > { %v958_v43 = vpop.permute.xlu0 %957 }
 0x23c   : > { %1563 = vrot.lane.b32.xlu1 %v3104_v41, %s2555_s6  ;;  %1692 = vrot.lane.b32.xlu0 %v3080_v16, %s3658_s11 }
 0x23e   : > { %v3182_v21 = vpop.permute.xlu0 %1166 }
 0x240   : > { %965 = vrot.lane.b32.xlu1 %v3084_v26, %s2551_s22  ;;  %1803 = vrot.lane.b32.xlu0 %v2994_v56, %s3659_s18  ;;  %s2468_s22 = sshll.u32 %s2560_s29, 4  ;;  %s2469_s22 = int_to_ptr.vmem [resolvable:$false] %s2468_s22 }
 0x242   : > { %v3188_v31 = vpop.permute.xlu0 %1293 }
 0x244   : > { %1686 = vrot.lane.b32.xlu1 %v3018_v3, %s3658_s11  ;;  %1807 = vrot.lane.b32.xlu0 %v3067_v62, %s3659_s18 }
 0x246   : > { %v1421_v45 = vpop.permute.xlu0 %1420 }
 0x248   : > { %1690 = vrot.lane.b32.xlu1 %v3104_v41, %s3658_s11  ;;  %1801 = vrot.lane.b32.xlu0 %v2986_v22, %s3659_s18 }
 0x24a   : > { %v1548_v37 = vpop.permute.xlu0 %1547 }
 0x24c   : > { %1684 = vrot.lane.b32.xlu1 %v3012_v12, %s3658_s11  ;;  %1815 = vrot.lane.b32.xlu0 %v3098_v27, %s3659_s18 }
 0x24e   : > { %v1675_v46 = vpop.permute.xlu0 %1674 }
 0x250   : > { %1174 = vrot.lane.b32.xlu1 %v3084_v26, %s2552_s23  ;;  %1819 = vrot.lane.b32.xlu0 %v3080_v16, %s3659_s18  ;;  %s2470_s23 = scalar_lea.vmem %s2469_s22, 128 }
 0x252   : > { %v960_v39 = vpop.permute.xlu0 %959 }
 0x253   : > { %v977_v53 = vsel %vm425_vm0, %v958_v43, %v960_v39 }
 0x254   : > { %1805 = vrot.lane.b32.xlu1 %v3061_v42, %s3659_s18  ;;  %1930 = vrot.lane.b32.xlu0 %v2994_v56, %s2558_s21 }
 0x256   : > { %v3210_v47 = vpop.permute.xlu0 %1168 }
 0x258   : > { %1301 = vrot.lane.b32.xlu1 %v3084_v26, %s2553_s24  ;;  %1934 = vrot.lane.b32.xlu0 %v3067_v62, %s2558_s21 }
 0x25a   : > { %v3216_v48 = vpop.permute.xlu0 %1295 }
 0x25c   : > { %1813 = vrot.lane.b32.xlu1 %v3018_v3, %s3659_s18  ;;  %1928 = vrot.lane.b32.xlu0 %v2986_v22, %s2558_s21 }
 0x25e   : > { %v962_v49 = vpop.permute.xlu1 %961  ;;  %v3222_v51 = vpop.permute.xlu0 %1422 }
 0x25f   : > { %v3226_v56 = vsel %vm480_vm7, %v1421_v45, %v3222_v51  ;;  %v978_v52 = vsel %vm425_vm0, %v960_v39, %v962_v49 }
 0x260   : > { %1428 = vrot.lane.b32.xlu1 %v3084_v26, %s2554_s25  ;;  %1942 = vrot.lane.b32.xlu0 %v3098_v27, %s2558_s21 }
 0x261   : > { %997 = vmatprep.subr.bf16.mxu1 %v978_v52 }
 0x262   : > { %998 = vmatpush1.bf16.msra.mxu1 %v977_v53  ;;  %v3234_v22 = vpop.permute.xlu1 %1170  ;;  %v3236_v58 = vpop.permute.xlu0 %1549 }
 0x263   : > { %v3240_v34 = vsel %vm495_vm6, %v1548_v37, %v3236_v58  ;;  %v1187_v33 = vsel %vm445_vm1, %v3210_v47, %v3234_v22 }
 0x264   : > { %1817 = vrot.lane.b32.xlu1 %v3104_v41, %s3659_s18  ;;  %1946 = vrot.lane.b32.xlu0 %v3080_v16, %s2558_s21 }
 0x266   : > { %v3246_v62 = vpop.permute.xlu1 %1297  ;;  %v1677_v0 = vpop.permute.xlu0 %1676 }
 0x267   : > { %v3249_v2 = vsel %vm514_vm8, %v1675_v46, %v1677_v0  ;;  %v3355_v46 = vld [vmem:[%s3640_s5 + $0x2] sm:$0x1] }
 0x268   : > { %1555 = vrot.lane.b32.xlu1 %v3084_v26, %s2555_s6  ;;  %2056 = vperm.xlu0 %2416, %v2053_v61   ;;  %s354_s6 = sand.u32 1, %s2530_s27  }
 0x26a   : > { %v3253_v6 = vpop.permute.xlu1 %1424  ;;  %v3255_v7 = vpop.permute.xlu0 %963 }
 0x26b   : > { %v3259_v59 = vsel %vm425_vm0, %v962_v49, %v3255_v7  ;;  %v1313_v49 = vsel %vm465_vm2, %v3188_v31, %v3216_v48  ;;  %v1441_v31 = vsel %vm480_vm7, %v3222_v51, %v3253_v6 }
 0x26c   : > { %1811 = vrot.lane.b32.xlu1 %v3012_v12, %s3659_s18 }
 0x26e   : > { %v3263_v8 = vpop.permute.xlu1 %1551  ;;  %v3265_v63 = vpop.permute.xlu0 %1172 }
 0x270   : > { %1682 = vrot.lane.b32.xlu1 %v3084_v26, %s3658_s11  ;;  %s2122_s11 = scalar_lea.sflag [#allocation5], %s354_s6 }
 0x272   : > { %v3269_v9 = vpop.permute.xlu1 %1678  ;;  %v3271_v10 = vpop.permute.xlu0 %1299 }
 0x273   : > { %v3275_v11 = vsel %vm514_vm8, %v1677_v0, %v3269_v9 }
 0x274   : > { %1932 = vrot.lane.b32.xlu1 %v3061_v42, %s2558_s21 }
 0x276   : > { %v968_v14 = vpop.permute.xlu1 %967  ;;  %v3279_v38 = vpop.permute.xlu0 %1426 }
 0x278   : > { %1809 = vrot.lane.b32.xlu1 %v3084_v26, %s3659_s18 }
 0x27a   : > { %v1177_v16 = vpop.permute.xlu1 %1176  ;;  %v3283_v17 = vpop.permute.xlu0 %1553 }
 0x27c   : > { %1940 = vrot.lane.b32.xlu1 %v3018_v3, %s2558_s21 }
 0x27e   : > { %v1304_v18 = vpop.permute.xlu1 %1303  ;;  %v3287_v24 = vpop.permute.xlu0 %1680 }
 0x280   : > { %1936 = vrot.lane.b32.xlu1 %v3084_v26, %s2558_s21 }
 0x282   : > { %v3291_v44 = vpop.permute.xlu1 %1430  ;;  %v3293_v42 = vpop.permute.xlu0 %971 }
 0x284   : > { %1944 = vrot.lane.b32.xlu1 %v3104_v41, %s2558_s21 }
 0x286   : > { %v3297_v25 = vpop.permute.xlu1 %1557  ;;  %v3299_v28 = vpop.permute.xlu0 %1180 }
 0x288   : > { %1938 = vrot.lane.b32.xlu1 %v3012_v12, %s2558_s21  ;;  %s2248_s21 = sshll.u32 %s354_s6, 2 }
 0x289   : > { %s356_s19 = scalar_lea.vmem [#allocation6], %s2248_s21 }
 0x28a   : > { %v970_v3 = vpop.permute.xlu1 %969  ;;  %v3303_v23 = vpop.permute.xlu0 %1307  ;;  %s2137_s9 = sshll.u32 %s356_s19, 4  ;;  %s3590_s9 = int_to_ptr.vmem [resolvable:$true] %s2137_s9 }
 0x28b   : > { %v981_v29 = vsel %vm425_vm0, %v968_v14, %v970_v3  ;;  %v982_v26 = vsel %vm425_vm0, %v970_v3, %v3293_v42  ;;  %s2464_s18 = scalar_lea.vmem %s3590_s9, 64  ;;  %p2471_p1 = scmp.lt.s32.totalorder %s3590_s9, %s2469_s22 }
 0x28c   : > { %999 = vmatprep.subr.bf16.mxu1 %v982_v26  ;;  %v1568_v26 = vsel %vm495_vm6, %v3236_v58, %v3263_v8  ;;  %p2465_p8 = scmp.ne.s32.totalorder %s3590_s9, %s2464_s18  ;;  %p2472_p3 = scmp.lt.s32.totalorder %s2470_s23, %s2464_s18 }
 0x28d   : > { %1000 = vmatpush1.bf16.msra.mxu1 %v981_v29 }
 0x28e   : > { %v1179_v12 = vpop.permute.xlu1 %1178  ;;  %2266 = vmatprep.subr.msk.bf16.mxu1 %vm2264_vm14, %v2990_v54  ;;  %v3317_v27 = vpop.permute.xlu0 %1434  ;;  %v3336_v54 = vld [vmem:[%s3640_s5] sm:$0x1]  ;;  %p2466_p11 = pnand %p2465_p8, %p3662_p10  ;;  %p2473_p5 = por %p2472_p3, %p2471_p1 }
 0x28f   : > { %v1190_v37 = vsel %vm445_vm1, %v1177_v16, %v1179_v12 }
 0x290   : > { %2262 = vmatmul.mubr.msk.bf16.vlgmr.msra.gmra.mrb[8].mxu1 %vm993_vm15, %v3314_v55  ;;  %p2467_p13 = pneg %p2466_p11 }
 0x291   : > { %2269 = vmatpush1.bf16.msk.msra.mxu1 %vm2267_vm3, %v2984_v13  ;;  %1114 = vmatprep.mubr.bf16.mxu1 %v2550_v5 }
 0x292   : > { %v1306_v35 = vpop.permute.xlu1 %1305  ;;  %2272 = vmatprep.subr.msk.bf16.mxu1 %vm2264_vm14, %v3016_v15  ;;  %v3327_v36 = vpop.permute.xlu0 %1561  ;;  %v1186_v15 = vsel %vm445_vm1, %v3182_v21, %v3210_v47  ;;  %v1314_v21 = vsel %vm465_vm2, %v3216_v48, %v3246_v62  ;;  %v3378_v48 = vld [vmem:[%s3640_s5 + $0x3] sm:$0x1]  ;;  %p2474_p6 = pnand %p2473_p5, %p2467_p13 }
 0x293   : > { %v1318_v52 = vsel %vm465_vm2, %v1306_v35, %v3303_v23  ;;  %v1317_v0 = vsel %vm465_vm2, %v1304_v18, %v1306_v35 }
 0x295   : > { %2275 = vmatpush1.bf16.msk.msra.mxu1 %vm2267_vm3, %v3010_v57  ;;  %v1191_v57 = vsel %vm445_vm1, %v1179_v12, %v3299_v28 }
 0x296   : > { %v1433_v41 = vpop.permute.xlu1 %1432  ;;  %1205 = vmatprep.subr.bf16.mxu1 %v1187_v33  ;;  %v976_v13 = vpop.permute.xlu0 %975 }
 0x297   : > { %v1445_v18 = vsel %vm480_vm7, %v1433_v41, %v3317_v27  ;;  %v1444_v3 = vsel %vm480_vm7, %v3291_v44, %v1433_v41 }
 0x298   : > { %2276 = vmatmul.mubr.msk.bf16.vlgmr.msra.gmra.mrb[12].mxu1 %vm993_vm15, %v3336_v54 }
 0x299   : > { %1206 = vmatpush1.bf16.msra.mxu1 %v1186_v15  ;;  %1237 = vmatprep.mubr.bf16.mxu1 %v2550_v5  ;;  %v3423_v15 = vld [vmem:[%s3640_s5 + $0x5] sm:$0x1] }
 0x29a   : > { %v1560_v43 = vpop.permute.xlu1 %1559  ;;  %1207 = vmatprep.subr.bf16.mxu1 %v1191_v57  ;;  %v3346_v45 = vpop.permute.xlu0 %1184 }
 0x29b   : > { %v1572_v44 = vsel %vm495_vm6, %v1560_v43, %v3327_v36  ;;  %v1571_v41 = vsel %vm495_vm6, %v3297_v25, %v1560_v43 }
 0x29d   : > { %1208 = vmatpush1.bf16.msra.mxu1 %v1190_v37 }
 0x29e   : > { %v974_v39 = vpop.permute.xlu1 %973  ;;  %1332 = vmatprep.subr.bf16.mxu1 %v1314_v21  ;;  %v3357_v47 = vpop.permute.xlu0 %1311  ;;  %v1315_v21 = vsel %vm465_vm2, %v3246_v62, %v3271_v10 }
 0x2a0   : > { %2291 = vmatmul.mubr.msk.bf16.vlgmr.msra.gmra.mrb[16].mxu1 %vm993_vm15, %v3355_v46 }
 0x2a1   : > { %1333 = vmatpush1.bf16.msra.mxu1 %v1313_v49  ;;  %1364 = vmatprep.mubr.bf16.mxu1 %v2550_v5 }
 0x2a2   : > { %v3367_v53 = vpop.permute.xlu1 %1182  ;;  %1334 = vmatprep.subr.bf16.mxu1 %v1318_v52  ;;  %v3369_v61 = vpop.permute.xlu0 %1438 }
 0x2a5   : > { %1335 = vmatpush1.bf16.msra.mxu1 %v1317_v0 }
 0x2a6   : > { %v3380_v14 = vpop.permute.xlu1 %1309  ;;  %1459 = vmatprep.subr.bf16.mxu1 %v1441_v31  ;;  %v3382_v16 = vpop.permute.xlu0 %1565 }
 0x2a7   : > { %v1319_v62 = vsel %vm465_vm2, %v3303_v23, %v3380_v14 }
 0x2a8   : > { %2294 = vmatmul.mubr.msk.bf16.vlgmr.msra.gmra.mrb[20].mxu1 %vm993_vm15, %v3378_v48 }
 0x2a9   : > { %1460 = vmatpush1.bf16.msra.mxu1 %v3226_v56  ;;  %1491 = vmatprep.mubr.bf16.mxu1 %v2550_v5  ;;  %v3402_v56 = vld [vmem:[%s3640_s5 + $0x4] sm:$0x1] }
 0x2aa   : > { %v3390_v51 = vpop.permute.xlu1 %1436  ;;  %1461 = vmatprep.subr.bf16.mxu1 %v1445_v18  ;;  %v3394_v29 = vpop.permute.xlu0 %1688 }
 0x2ab   : > { %v1447_v23 = vsel %vm480_vm7, %v3390_v51, %v3369_v61  ;;  %v1446_v31 = vsel %vm480_vm7, %v3317_v27, %v3390_v51 }
 0x2ad   : > { %1462 = vmatpush1.bf16.msra.mxu1 %v1444_v3 }
 0x2ae   : > { %v3404_v12 = vpop.permute.xlu1 %1563  ;;  %1586 = vmatprep.subr.bf16.mxu1 %v1568_v26  ;;  %v3412_v58 = vpop.permute.xlu0 %1692  ;;  %v1696_v26 = vsel %vm514_vm8, %v3269_v9, %v3287_v24 }
 0x2af   : > { %v1574_v61 = vsel %vm495_vm6, %v3404_v12, %v3382_v16 }
 0x2b0   : > { %2297 = vmatmul.mubr.msk.bf16.vlgmr.msra.gmra.mrb[24].mxu1 %vm993_vm15, %v3402_v56 }
 0x2b1   : > { %1587 = vmatpush1.bf16.msra.mxu1 %v3240_v34  ;;  %1618 = vmatprep.mubr.bf16.mxu1 %v2550_v5  ;;  %v984_v34 = vsel %vm425_vm0, %v974_v39, %v976_v13 }
 0x2b2   : > { %v966_v35 = vpop.permute.xlu1 %965  ;;  %1588 = vmatprep.subr.bf16.mxu1 %v1572_v44  ;;  %v1804_v25 = vpop.permute.xlu0 %1803 }
 0x2b3   : > { %v980_v33 = vsel %vm425_vm0, %v3255_v7, %v966_v35 }
 0x2b4   : > { %1038 = vmatprep.subr.bf16.mxu0 %v980_v33 }
 0x2b5   : > { %1039 = vmatpush1.bf16.msra.mxu0 %v3259_v59  ;;  %1589 = vmatpush1.bf16.msra.mxu1 %v1571_v41  ;;  %v983_v59 = vsel %vm425_vm0, %v3293_v42, %v974_v39  ;;  %vm2280_vm0 = vmpackc.low %vm911_vm11, %vm911_vm11 }
 0x2b6   : > { %v1687_v57 = vpop.permute.xlu1 %1686  ;;  %1040 = vmatprep.subr.bf16.mxu0 %v984_v34  ;;  %1713 = vmatprep.subr.bf16.mxu1 %v3275_v11 }
 0x2b7   : > { %v1699_v11 = vsel %vm514_vm8, %v1687_v57, %v3394_v29 }
 0x2b8   : > { %2300 = vmatmul.mubr.msk.bf16.vlgmr.msra.gmra.mrb[28].mxu1 %vm993_vm15, %v3423_v15 }
 0x2b9   : > { %1041 = vmatpush1.bf16.msra.mxu0 %v983_v59  ;;  %1714 = vmatpush1.bf16.msra.mxu1 %v3249_v2  ;;  %v3462_v2 = vld [vmem:[%s3640_s5 + $0x6] sm:$0x1] }
 0x2ba   : > { %v3440_v13 = vpop.permute.xlu1 %1690  ;;  %2279 = vmatprep.subr.msk.bf16.mxu0 %vm3429_vm4, %v3065_v60  ;;  %1715 = vmatprep.subr.bf16.mxu1 %v1699_v11  ;;  %v3456_v60 = vpop.permute.xlu0 %1807 }
 0x2bb   : > { %1745 = vmatprep.mubr.bf16.mxu1 %v2550_v5  ;;  %v1700_v9 = vsel %vm514_vm8, %v3394_v29, %v3440_v13 }
 0x2bc   : > { %2263 = vmatmul.mubr.msk.bf16.vlgmr.msra.gmra.mrb[12].mxu0 %vm993_vm15, %v3314_v55 }
 0x2bd   : > { %2282 = vmatpush1.bf16.msk.msra.mxu0 %vm2280_vm0, %v3058_v50  ;;  %1155 = vmatprep.mubr.bf16.mxu0 %v2550_v5 }
 0x2be   : > { %v1685_v20 = vpop.permute.xlu1 %1684  ;;  %2285 = vmatprep.subr.msk.bf16.mxu0 %vm3429_vm4, %v3102_v40  ;;  %v1188_v40 = vsel %vm445_vm1, %v3234_v22, %v3265_v63  ;;  %v1802_v55 = vpop.permute.xlu0 %1801 }
 0x2bf   : > { %v1698_v19 = vsel %vm514_vm8, %v1685_v20, %v1687_v57 }
 0x2c0   : > { %1716 = vmatpush1.bf16.msra.mxu1 %v1698_v19  ;;  %v2308_v19 = vld [vmem:[%s3640_s5 + $0x8] sm:$0x1] }
 0x2c1   : > { %2288 = vmatpush1.bf16.msk.msra.mxu0 %vm2280_vm0, %v3094_v32  ;;  %v1193_v32 = vsel %vm445_vm1, %v3367_v53, %v3346_v45 }
 0x2c2   : > { %v1175_v50 = vpop.permute.xlu1 %1174  ;;  %v3494_v39 = vpop.permute.xlu0 %1815 }
 0x2c3   : > { %v1189_v42 = vsel %vm445_vm1, %v3265_v63, %v1175_v50  ;;  %2303 = vmatmul.mubr.msk.bf16.vlgmr.msra.gmra.mrb[32].mxu1 %vm993_vm15, %v3462_v2  ;;  %v1192_v63 = vsel %vm445_vm1, %v3299_v28, %v3367_v53  ;;  %v1320_v28 = vsel %vm465_vm2, %v3380_v14, %v3357_v47  ;;  %v1442_v47 = vsel %vm480_vm7, %v3253_v6, %v3279_v38 }
 0x2c4   : > { %2289 = vmatmul.mubr.msk.bf16.vlgmr.msra.gmra.mrb[16].mxu0 %vm993_vm15, %v3336_v54  ;;  %1246 = vmatprep.subr.bf16.mxu0 %v1189_v42  ;;  %v1821_v54 = vsel %vm533_vm9, %v1802_v55, %v1804_v25  ;;  %vm2118_vm1 = vcmp.lt.s32.totalorder %v396_v1, 512 }
 0x2c5   : > { %1247 = vmatpush1.bf16.msra.mxu0 %v1188_v40  ;;  %1278 = vmatprep.mubr.bf16.mxu0 %v2550_v5 }
 0x2c6   : > { %v3478_v43 = vpop.permute.xlu1 %1805  ;;  %1248 = vmatprep.subr.bf16.mxu0 %v1193_v32  ;;  %1872 = vmatprep.mubr.bf16.mxu1 %v2550_v5 }
 0x2c7   : > { %v1822_v22 = vsel %vm533_vm9, %v1804_v25, %v3478_v43  ;;  %v1823_v33 = vsel %vm533_vm9, %v3478_v43, %v3456_v60 }
 0x2c8   : > { %1840 = vmatprep.subr.bf16.mxu1 %v1822_v22 }
 0x2c9   : > { %1249 = vmatpush1.bf16.msra.mxu0 %v1192_v63  ;;  %1841 = vmatpush1.bf16.msra.mxu1 %v1821_v54 }
 0x2ca   : > { %v1302_v45 = vpop.permute.xlu1 %1301 }
 0x2cb   : > { %v1316_v37 = vsel %vm465_vm2, %v3271_v10, %v1302_v45 }
 0x2cc   : > { %2292 = vmatmul.mubr.msk.bf16.vlgmr.msra.gmra.mrb[20].mxu0 %vm993_vm15, %v3355_v46  ;;  %1373 = vmatprep.subr.bf16.mxu0 %v1316_v37  ;;  %v1820_v46 = vpop.permute.xlu0 %1819 }
 0x2cd   : > { %1374 = vmatpush1.bf16.msra.mxu0 %v1315_v21  ;;  %1405 = vmatprep.mubr.bf16.mxu0 %v2550_v5 }
 0x2ce   : > { %v1814_v49 = vpop.permute.xlu1 %1813  ;;  %1375 = vmatprep.subr.bf16.mxu0 %v1320_v28 }
 0x2cf   : > { %v1826_v52 = vsel %vm533_vm9, %v1814_v49, %v3494_v39 }
 0x2d0   : > { %1842 = vmatprep.subr.bf16.mxu1 %v1826_v52  ;;  %v1931_v14 = vpop.permute.xlu0 %1930 }
 0x2d1   : > { %1376 = vmatpush1.bf16.msra.mxu0 %v1319_v62 }
 0x2d2   : > { %v1429_v10 = vpop.permute.xlu1 %1428 }
 0x2d3   : > { %v1443_v53 = vsel %vm480_vm7, %v3279_v38, %v1429_v10 }
 0x2d4   : > { %2295 = vmatmul.mubr.msk.bf16.vlgmr.msra.gmra.mrb[24].mxu0 %vm993_vm15, %v3378_v48  ;;  %1500 = vmatprep.subr.bf16.mxu0 %v1443_v53  ;;  %v1569_v48 = vsel %vm495_vm6, %v3263_v8, %v3283_v17  ;;  %v1935_v18 = vpop.permute.xlu0 %1934  ;;  %v1573_v8 = vsel %vm495_vm6, %v3327_v36, %v3404_v12 }
 0x2d5   : > { %1501 = vmatpush1.bf16.msra.mxu0 %v1442_v47  ;;  %1532 = vmatprep.mubr.bf16.mxu0 %v2550_v5 }
 0x2d6   : > { %v1818_v0 = vpop.permute.xlu1 %1817  ;;  %1502 = vmatprep.subr.bf16.mxu0 %v1447_v23 }
 0x2d7   : > { %v1828_v29 = vsel %vm533_vm9, %v1818_v0, %v1820_v46  ;;  %v1827_v57 = vsel %vm533_vm9, %v3494_v39, %v1818_v0 }
 0x2d8   : > { %v1929_v36 = vpop.permute.xlu0 %1928 }
 0x2d9   : > { %1503 = vmatpush1.bf16.msra.mxu0 %v1446_v31 }
 0x2da   : > { %v1556_v6 = vpop.permute.xlu1 %1555 }
 0x2db   : > { %v1570_v38 = vsel %vm495_vm6, %v3283_v17, %v1556_v6  ;;  %v2305_v17 = vld [vmem:[%s3640_s5 + $0x7] sm:$0x1] }
 0x2dc   : > { %2298 = vmatmul.mubr.msk.bf16.vlgmr.msra.gmra.mrb[28].mxu0 %vm993_vm15, %v3402_v56  ;;  %1627 = vmatprep.subr.bf16.mxu0 %v1570_v38  ;;  %v1701_v56 = vsel %vm514_vm8, %v3440_v13, %v3412_v58  ;;  %v1943_v41 = vpop.permute.xlu0 %1942 }
 0x2dd   : > { %1628 = vmatpush1.bf16.msra.mxu0 %v1569_v48  ;;  %1659 = vmatprep.mubr.bf16.mxu0 %v2550_v5 }
 0x2de   : > { %v1812_v27 = vpop.permute.xlu1 %1811  ;;  %1629 = vmatprep.subr.bf16.mxu0 %v1574_v61 }
 0x2df   : > { %v1825_v51 = vsel %vm533_vm9, %v1812_v27, %v1814_v49 }
 0x2e0   : > { %1843 = vmatpush1.bf16.msra.mxu1 %v1825_v51  ;;  %v1947_v11 = vpop.permute.xlu0 %1946 }
 0x2e1   : > { %1630 = vmatpush1.bf16.msra.mxu0 %v1573_v8 }
 0x2e2   : > { %v1683_v3 = vpop.permute.xlu1 %1682 }
 0x2e3   : > { %2306 = vmatmul.mubr.msk.bf16.vlgmr.msra.gmra.mrb[36].mxu1 %vm993_vm15, %v2305_v17  ;;  %v1697_v16 = vsel %vm514_vm8, %v3287_v24, %v1683_v3  ;;  %v1948_v24 = vsel %vm551_vm10, %v1929_v36, %v1931_v14 }
 0x2e4   : > { %2301 = vmatmul.mubr.msk.bf16.vlgmr.msra.gmra.mrb[32].mxu0 %vm993_vm15, %v3423_v15  ;;  %1754 = vmatprep.subr.bf16.mxu0 %v1697_v16 }
 0x2e5   : > { %1755 = vmatpush1.bf16.msra.mxu0 %v1696_v26  ;;  %1786 = vmatprep.mubr.bf16.mxu0 %v2550_v5 }
 0x2e6   : > { %v1933_v12 = vpop.permute.xlu1 %1932  ;;  %1756 = vmatprep.subr.bf16.mxu0 %v1701_v56  ;;  %1999 = vmatprep.mubr.bf16.mxu1 %v2550_v5 }
 0x2e7   : > { %v1949_v44 = vsel %vm551_vm10, %v1931_v14, %v1933_v12  ;;  %v1950_v25 = vsel %vm551_vm10, %v1933_v12, %v1935_v18 }
 0x2e8   : > { %1967 = vmatprep.subr.bf16.mxu1 %v1949_v44 }
 0x2e9   : > { %1757 = vmatpush1.bf16.msra.mxu0 %v1700_v9  ;;  %1968 = vmatpush1.bf16.msra.mxu1 %v1948_v24 }
 0x2ea   : > { %v1810_v35 = vpop.permute.xlu1 %1809 }
 0x2eb   : > { %v1824_v58 = vsel %vm533_vm9, %v3456_v60, %v1810_v35 }
 0x2ec   : > { %2304 = vmatmul.mubr.msk.bf16.vlgmr.msra.gmra.mrb[36].mxu0 %vm993_vm15, %v3462_v2  ;;  %1881 = vmatprep.subr.bf16.mxu0 %v1824_v58 }
 0x2ed   : > { %1882 = vmatpush1.bf16.msra.mxu0 %v1823_v33  ;;  %1913 = vmatprep.mubr.bf16.mxu0 %v2550_v5 }
 0x2ee   : > { %v1941_v34 = vpop.permute.xlu1 %1940  ;;  %1883 = vmatprep.subr.bf16.mxu0 %v1828_v29 }
 0x2ef   : > { %v1953_v15 = vsel %vm551_vm10, %v1941_v34, %v1943_v41 }
 0x2f0   : > { %1969 = vmatprep.subr.bf16.mxu1 %v1953_v15 }
 0x2f1   : > { %1884 = vmatpush1.bf16.msra.mxu0 %v1827_v57 }
 0x2f2   : > { %v1937_v7 = vpop.permute.xlu1 %1936 }
 0x2f3   : > { %v1951_v59 = vsel %vm551_vm10, %v1935_v18, %v1937_v7 }
 0x2f4   : > { %2307 = vmatmul.mubr.msk.bf16.vlgmr.msra.gmra.mrb[40].mxu0 %vm993_vm15, %v2305_v17  ;;  %2008 = vmatprep.subr.bf16.mxu0 %v1951_v59 }
 0x2f5   : > { %2009 = vmatpush1.bf16.msra.mxu0 %v1950_v25  ;;  %2040 = vmatprep.mubr.bf16.mxu0 %v2550_v5 }
 0x2f6   : > { %v1945_v13 = vpop.permute.xlu1 %1944 }
 0x2f7   : > { %v1954_v20 = vsel %vm551_vm10, %v1943_v41, %v1945_v13  ;;  %v1955_v60 = vsel %vm551_vm10, %v1945_v13, %v1947_v11 }
 0x2f8   : > { %2010 = vmatprep.subr.bf16.mxu0 %v1955_v60 }
 0x2f9   : > { %2011 = vmatpush1.bf16.msra.mxu0 %v1954_v20 }
 0x2fa   : > { %v1939_v2 = vpop.permute.xlu1 %1938 }
 0x2fb   : > { %v1952_v50 = vsel %vm551_vm10, %v1939_v2, %v1941_v34 }
 0x2fc   : > { %1970 = vmatpush1.bf16.msra.mxu1 %v1952_v50  ;;  %2310 = vmatmul.mubr.msk.bf16.vlgmr.msra.gmra.mrb[44].mxu0 %vm993_vm15, %v2308_v19 }
 0x2ff   : > { %2309 = vmatmul.mubr.msk.bf16.vlgmr.msra.gmra.mrb[40].mxu1 %vm993_vm15, %v2308_v19 }
 0x363   : > { %v1031_v5 = vpop.f32.mrb[8].mxu1 }
 0x364   : > { %v1033_v42 = vpop.f32.mrb[9].mxu1 }
 0x365   : > { %v1035_v40 = vpop.f32.mrb[10].mxu1 }
 0x366   : > { %v1036_v55 = vpop.f32.mrb[11].mxu1 }
 0x36b   : > { %v1116_v32 = vpop.f32.mrb[12].mxu1 }
 0x36c   : > { %v1117_v43 = vadd.f32 %v1116_v32, %v1031_v5  ;;  %v1118_v22 = vpop.f32.mrb[13].mxu1 }
 0x36d   : > { %v1119_v63 = vadd.f32 %v1118_v22, %v1033_v42  ;;  %v1120_v54 = vpop.f32.mrb[14].mxu1 }
 0x36e   : > { %v1121_v45 = vpop.f32.mrb[15].mxu1 }
 0x373   : > { %v1239_v37 = vpop.f32.mrb[16].mxu1 }
 0x374   : > { %v1287_v21 = vadd.f32 %v1239_v37, %v1117_v43  ;;  %v1241_v39 = vpop.f32.mrb[17].mxu1 }
 0x375   : > { %v1288_v28 = vadd.f32 %v1241_v39, %v1119_v63  ;;  %v1243_v49 = vpop.f32.mrb[18].mxu1 }
 0x376   : > { %v1244_v52 = vpop.f32.mrb[19].mxu1 }
 0x37b   : > { %v1366_v62 = vpop.f32.mrb[20].mxu1 }
 0x37c   : > { %v1414_v10 = vadd.f32 %v1366_v62, %v1287_v21  ;;  %v1368_v46 = vpop.f32.mrb[21].mxu1 }
 0x37d   : > { %v1415_v53 = vadd.f32 %v1368_v46, %v1288_v28  ;;  %v1370_v47 = vpop.f32.mrb[22].mxu1 }
 0x37e   : > { %v1371_v23 = vpop.f32.mrb[23].mxu1 }
 0x383   : > { %v1493_v0 = vpop.f32.mrb[24].mxu1 }
 0x384   : > { %v1541_v31 = vadd.f32 %v1493_v0, %v1414_v10  ;;  %v1495_v14 = vpop.f32.mrb[25].mxu1 }
 0x385   : > { %v1542_v6 = vadd.f32 %v1495_v14, %v1415_v53  ;;  %v1497_v38 = vpop.f32.mrb[26].mxu1 }
 0x386   : > { %v1498_v48 = vpop.f32.mrb[27].mxu1 }
 0x38b   : > { %v1620_v61 = vpop.f32.mrb[28].mxu1 }
 0x38c   : > { %v1668_v27 = vadd.f32 %v1620_v61, %v1541_v31  ;;  %v1622_v18 = vpop.f32.mrb[29].mxu1 }
 0x38d   : > { %v1669_v51 = vadd.f32 %v1622_v18, %v1542_v6  ;;  %v1624_v8 = vpop.f32.mrb[30].mxu1 }
 0x38e   : > { %v1625_v17 = vpop.f32.mrb[31].mxu1 }
 0x38f   : > { %v1072_v3 = vpop.f32.mrb[12].mxu0 }
 0x390   : > { %v1074_v16 = vpop.f32.mrb[13].mxu0 }
 0x391   : > { %v1076_v26 = vpop.f32.mrb[14].mxu0 }
 0x392   : > { %v1077_v36 = vpop.f32.mrb[15].mxu0 }
 0x396   : > { %v1747_v56 = vpop.f32.mrb[32].mxu1 }
 0x397   : > { %v1157_v12 = vpop.f32.mrb[16].mxu0  ;;  %v1795_v44 = vadd.f32 %v1747_v56, %v1668_v27  ;;  %v1749_v9 = vpop.f32.mrb[33].mxu1 }
 0x398   : > { %v1158_v24 = vadd.f32 %v1157_v12, %v1072_v3  ;;  %v1159_v35 = vpop.f32.mrb[17].mxu0  ;;  %v1796_v58 = vadd.f32 %v1749_v9, %v1669_v51  ;;  %v1751_v33 = vpop.f32.mrb[34].mxu1 }
 0x399   : > { %v1160_v29 = vadd.f32 %v1159_v35, %v1074_v16  ;;  %v1161_v41 = vpop.f32.mrb[18].mxu0  ;;  %v1752_v34 = vpop.f32.mrb[35].mxu1 }
 0x39a   : > { %v1162_v15 = vpop.f32.mrb[19].mxu0  ;;  %v2057_v51 = vpop.permute.xlu0 %2056 }
 0x39b   : > { %v2062_v17 = vrot.slane %v2057_v51, %v891_v30 }
 0x39f   : > { %v1280_v57 = vpop.f32.mrb[20].mxu0 }
 0x3a0   : > { %v1289_v7 = vadd.f32 %v1280_v57, %v1158_v24  ;;  %v1282_v59 = vpop.f32.mrb[21].mxu0 }
 0x3a1   : > { %v1290_v25 = vadd.f32 %v1282_v59, %v1160_v29  ;;  %v1284_v11 = vpop.f32.mrb[22].mxu0 }
 0x3a2   : > { %v1285_v13 = vpop.f32.mrb[23].mxu0 }
 0x3a7   : > { %v1407_v20 = vpop.f32.mrb[24].mxu0 }
 0x3a8   : > { %v1416_v60 = vadd.f32 %v1407_v20, %v1289_v7  ;;  %v1409_v19 = vpop.f32.mrb[25].mxu0 }
 0x3a9   : > { %v1417_v2 = vadd.f32 %v1409_v19, %v1290_v25  ;;  %v1411_v50 = vpop.f32.mrb[26].mxu0 }
 0x3aa   : > { %v1412_v5 = vpop.f32.mrb[27].mxu0 }
 0x3af   : > { %v1534_v42 = vpop.f32.mrb[28].mxu0 }
 0x3b0   : > { %v1543_v40 = vadd.f32 %v1534_v42, %v1416_v60  ;;  %v1536_v55 = vpop.f32.mrb[29].mxu0 }
 0x3b1   : > { %v1544_v32 = vadd.f32 %v1536_v55, %v1417_v2  ;;  %v1538_v43 = vpop.f32.mrb[30].mxu0  ;;  %v2559_v55 = vmov 1966171168  }
 0x3b2   : > { %v1539_v22 = vpop.f32.mrb[31].mxu0 }
 0x3b6   : > { %v1874_v63 = vpop.f32.mrb[36].mxu1 }
 0x3b7   : > { %v1922_v54 = vadd.f32 %v1874_v63, %v1795_v44  ;;  %v1661_v45 = vpop.f32.mrb[32].mxu0  ;;  %v1876_v37 = vpop.f32.mrb[37].mxu1 }
 0x3b8   : > { %v1670_v21 = vadd.f32 %v1661_v45, %v1543_v40  ;;  %v1923_v39 = vadd.f32 %v1876_v37, %v1796_v58  ;;  %v1663_v28 = vpop.f32.mrb[33].mxu0  ;;  %v1878_v49 = vpop.f32.mrb[38].mxu1 }
 0x3b9   : > { %v1671_v52 = vadd.f32 %v1663_v28, %v1544_v32  ;;  %v1665_v62 = vpop.f32.mrb[34].mxu0  ;;  %v1879_v10 = vpop.f32.mrb[39].mxu1  ;;  %v2094_v32 = vunpack.c.l.s4 %v2559_v55 }
 0x3ba   : > { %v1666_v46 = vpop.f32.mrb[35].mxu0 }
 0x3bb   : > { %v2095_v43 = vunpack.c.0.s8 %v2094_v32 }
 0x3bd   : > { %v2098_v37 = vsub.s32 %v2095_v43, %v2702_v4 }
 0x3bf   : > { %v1788_v53 = vpop.f32.mrb[36].mxu0 }
 0x3c0   : > { %v1797_v47 = vadd.f32 %v1788_v53, %v1670_v21  ;;  %v1790_v23 = vpop.f32.mrb[37].mxu0 }
 0x3c1   : > { %v1798_v0 = vadd.f32 %v1790_v23, %v1671_v52  ;;  %v1792_v31 = vpop.f32.mrb[38].mxu0 }
 0x3c2   : > { %v1793_v14 = vpop.f32.mrb[39].mxu0 }
 0x3c7   : > { %v1915_v6 = vpop.f32.mrb[40].mxu0 }
 0x3c8   : > { %v1924_v38 = vadd.f32 %v1915_v6, %v1797_v47  ;;  %v1917_v48 = vpop.f32.mrb[41].mxu0 }
 0x3c9   : > { %v1925_v61 = vadd.f32 %v1917_v48, %v1798_v0  ;;  %v1919_v27 = vpop.f32.mrb[42].mxu0 }
 0x3ca   : > { %v1920_v18 = vpop.f32.mrb[43].mxu0 }
 0x3cf   : > { %v2042_v8 = vpop.f32.mrb[44].mxu0 }
 0x3d0   : > { %v2051_v3 = vadd.f32 %v2042_v8, %v1924_v38  ;;  %v2044_v16 = vpop.f32.mrb[45].mxu0 }
 0x3d1   : > { %v2052_v26 = vadd.f32 %v2044_v16, %v1925_v61  ;;  %v2046_v36 = vpop.f32.mrb[46].mxu0 }
 0x3d2   : > { %v2065_v56 = vadd.f32 %v2062_v17, %v2051_v3  ;;  %v2001_v12 = vpop.f32.mrb[40].mxu1  ;;  %v2047_v44 = vpop.f32.mrb[47].mxu0 }
 0x3d3   : > { %v2066_v9 = vadd.f32 %v2062_v17, %v2052_v26  ;;  %v2049_v24 = vadd.f32 %v2001_v12, %v1922_v54  ;;  %v2003_v35 = vpop.f32.mrb[41].mxu1 }
 0x3d4   : > { %v2069_v58 = vsub.f32 0.0, %v2065_v56  ;;  %v2050_v33 = vadd.f32 %v2003_v35, %v1923_v39  ;;  %v2005_v29 = vpop.f32.mrb[42].mxu1 }
 0x3d5   : > { %v2070_v41 = vsub.f32 0.0, %v2066_v9  ;;  %v2063_v34 = vadd.f32 %v2062_v17, %v2049_v24  ;;  %v2006_v15 = vpop.f32.mrb[43].mxu1 }
 0x3d6   : > { %v2075_v57 = vmul.f32 1.442695, %v2069_v58  ;;  %v2064_v7 = vadd.f32 %v2062_v17, %v2050_v33 }
 0x3d7   : > { %v2077_v59 = vmul.f32 1.442695, %v2070_v41  ;;  %v2067_v30 = vsub.f32 0.0, %v2063_v34 }
 0x3d8   : > { %2420 = vpow2.f32 %v2075_v57  ;;  %v2068_v25 = vsub.f32 0.0, %v2064_v7 }
 0x3d9   : > { %2422 = vpow2.f32 %v2077_v59  ;;  %v2071_v11 = vmul.f32 1.442695, %v2067_v30 }
 0x3da   : > { %v2073_v13 = vmul.f32 1.442695, %v2068_v25 }
 0x3db   : > { %2424 = vpow2.f32 %v2071_v11 }
 0x3dc   : > { %2426 = vpow2.f32 %v2073_v13 }
 0x3e2   : > { %v2421_v20 = vpop.eup %2420 }
 0x3e3   : > { %v2423_v60 = vpop.eup %2422  ;;  %v2081_v19 = vadd.f32 1.0, %v2421_v20 }
 0x3e4   : > { %v2082_v2 = vadd.f32 1.0, %v2423_v60 }
 0x3e5   : > { %v2425_v50 = vpop.eup %2424  ;;  %2428 = vrcp.f32 %v2081_v19 }
 0x3e6   : > { %v2427_v5 = vpop.eup %2426  ;;  %2430 = vrcp.f32 %v2082_v2  ;;  %v2079_v42 = vadd.f32 1.0, %v2425_v50 }
 0x3e7   : > { %v2080_v40 = vadd.f32 1.0, %v2427_v5 }
 0x3e8   : > { %2432 = vrcp.f32 %v2079_v42 }
 0x3e9   : > { %2434 = vrcp.f32 %v2080_v40 }
 0x3ef   : > { %v2429_v22 = vpop.eup %2428 }
 0x3f0   : > { %v2431_v63 = vpop.eup %2430 }
 0x3f1   : > { %v2092_v54 = vcombine.low %v2429_v22, %v2431_v63 }
 0x3f2   : > { %v2433_v45 = vpop.eup %2432 }
 0x3f3   : > { %v2435_v21 = vpop.eup %2434  ;;  %v2106_v49 = vrot.slane %v2092_v54, %v2098_v37 }
 0x3f4   : > { %v2091_v39 = vcombine.low %v2433_v45, %v2435_v21 }
 0x3f6   : > { %v2099_v28 = vrot.slane %v2091_v39, %v2098_v37 }
 0x3f8   : > { %v2107_v52 = vcombine.low %v2099_v28, %v2106_v49 }
 0x3fa   : > { %v2114_v62 = vrot.slane %v2107_v52, %v2098_v37 }
 0x3fc   : > { %2120 = vst.msk [vmem:[%s356_s19] sm:$0xf] %vm2118_vm1, %v2114_v62 }
 0x3fd   : > { %2477 = shalt.err (!%p2474_p6)
}
 0x3fe   : > { %s2478_s24 = scalar_lea.hbm %s3588_s16, 64  ;;  %s2482_s21 = scalar_lea.hbm %s3642_s7, 128 }
 0x3ff   : > { %p2479_p7 = scmp.ne.s32.totalorder %s3588_s16, %s2478_s24  ;;  %p2483_p0 = scmp.lt.u32.totalorder %s3588_s16, %s3642_s7 }
 0x400   : > { %p2484_p2 = scmp.lt.u32.totalorder %s2482_s21, %s2478_s24  ;;  %p2486_p8 = scmp.lt.u32.totalorder %s2478_s24, %s3588_s16 }
 0x401   : > { %p2480_p9 = pnand %p2479_p7, %p3662_p10 }
 0x402   : > { %p2485_p4 = por %p2484_p2, %p2483_p0 }
 0x403   : > { %p2481_p12 = pneg %p2480_p9 }
 0x404   : > { %p2487_p11 = por %p2486_p8, %p2485_p4 }
 0x406   : > { %p2488_p13 = pnand %p2487_p11, %p2481_p12 }
 0x408   : > { %2491 = shalt.err (!%p2488_p13)
}
 0x409   : > { %2341 = dma.vmem_to_hbm [thread:$0]  (%p3662_p10), %s3590_s9, 64, %s3588_s16, %s2122_s11  }
 0x40a PF: > { %p2354_p1 = scmp.ge.s32.totalorder %s2546_s8, 2  ;;  %s2149_s13 = sand.u32 1, %s2526_s26  }
 0x40b   : > { %p3663_p3 = scmp.ne.s32.totalorder %s3652_s14, 0  ;;  %s2150_s20 = scalar_lea.sflag [#allocation5], %s2149_s13 }
 0x40d   : > { %p2348_p5 = pnand %p2354_p1, %p3663_p3 }
 0x40f   : > { %2521 = dma.done.wait (!%p2348_p5), %s2150_s20, 64  }
 0x410   : > { %2523 = vsyncadd (!%p2348_p5), %s2150_s20, 4294967232  ;;  %s23_s8 = sadd.s32 1, %s2546_s8   ;;  %s3664_s26 = smov %s2530_s27 }
 0x411   : > { %p20_p6 = scmp.ge.s32.totalorder %s23_s8, 4   ;;  %s3665_s27 = smov %s2534_s28 }
 0x412   : > { %s3666_s28 = smov %s2657_s15  ;;  %s3667_s29 = smov %s2542_s30 }
 0x413   : > { %s3668_s30 = smov %s3670_s10  ;;  %22 = sbr.rel (!%p20_p6) target bundleno = 8 (0x8), region = 100 }
 0x41a   :  { %2155 = vsyncpa [#allocation4], 1 }
 0x41b   :  { %2157 = vsyncpa [#allocation4 + $0x1], 1 }
 0x41c   :  { %2158 = vsyncpa [#allocation5], 1 }
 0x41d   :  { %2160 = vsyncpa [#allocation5 + $0x1], 1 }

</bundles_post_ra>
